<compile_context>
chip_gen: v5e
topology: v5e:2x2
jax: 0.10.0
libtpu: 0.0.40
codegen_flags: <defaults>
</compile_context>

<pallas_src>
import jax
import jax.numpy as jnp
from jax.experimental import pallas as pl
from jax.experimental.pallas import tpu as pltpu

GATE_PITCH = 128  # lane-aligned slot per gate (r, z, n)
OUT_PITCH = 128   # padded FC output lanes (>= output_size), unmasked store


def _make_kernel(num_layers, seq_len, batch_pad, hidden, gate_pitch):
    L, T, BP, H, GP = num_layers, seq_len, batch_pad, hidden, gate_pitch

    def sigmoid(v):
        # One EUP push (tanh) instead of exp + reciprocal.
        return 0.5 * jnp.tanh(0.5 * v) + 0.5

    def kernel(*refs):
        # refs = x, (w_ih, w_hh, b_gi, b_hn) * L, fc_w, fc_b, out, seq_buf
        x_ref = refs[0]
        layer_refs = [refs[1 + 4 * l: 1 + 4 * (l + 1)] for l in range(L)]
        fc_w_ref = refs[1 + 4 * L]
        fc_b_ref = refs[2 + 4 * L]
        out_ref = refs[3 + 4 * L]
        seq_buf = refs[4 + 4 * L]          # VMEM scratch (T*BP, GP) f32

        h = None
        for l in range(L):
            w_ih_ref, w_hh_ref, b_gi_ref, b_hn_ref = layer_refs[l]

            if l == 0:
                seq = x_ref[...]                                   # (T*BP, I) bf16
            else:
                # Offset-0 lane slice of the previous layer's hidden sequence;
                # single off-critical-path cast per layer.
                seq = seq_buf[...][:, :H].astype(jnp.bfloat16)     # (T*BP, H)

            # Input projection for ALL timesteps in one MXU call per layer
            # (off the serial recurrence path).  r/z biases (b_ih+b_hh) and
            # b_in are folded into b_gi on the host.
            gi_all = jnp.dot(seq, w_ih_ref[...],
                             preferred_element_type=jnp.float32) + b_gi_ref[...]

            w_hh = w_hh_ref[...]                                   # (H, 3*GP) bf16
            # Hoisted once per layer (JAX does not CSE broadcast_in_dim).
            b_hn_b = jnp.broadcast_to(b_hn_ref[...], (BP, GP))     # (BP, GP) f32

            h = jnp.zeros((BP, GP), jnp.float32)
            for t in range(T):                                     # fully unrolled
                gi_t = gi_all[t * BP:(t + 1) * BP, :]              # tile-aligned slice
                if t == 0:
                    # h == 0  =>  gh == 0: skip the recurrent matmul entirely.
                    rz = sigmoid(gi_t[:, 0:2 * GP])
                    r = rz[:, 0:GP]
                    z = rz[:, GP:2 * GP]
                    n = jnp.tanh(gi_t[:, 2 * GP:3 * GP] + r * b_hn_b)
                    h = (1.0 - z) * n
                else:
                    gh = jnp.dot(h[:, :H].astype(jnp.bfloat16), w_hh,
                                 preferred_element_type=jnp.float32)
                    # Single sigmoid push over the r and z slots together.
                    rz = sigmoid(gi_t[:, 0:2 * GP] + gh[:, 0:2 * GP])
                    r = rz[:, 0:GP]
                    z = rz[:, GP:2 * GP]
                    n = jnp.tanh(gi_t[:, 2 * GP:3 * GP]
                                 + r * (gh[:, 2 * GP:3 * GP] + b_hn_b))
                    h = (1.0 - z) * n + z * h
                if l + 1 < L:
                    # Tile-aligned (8,128) f32 store; feeds the next layer's
                    # big input-projection matmul.
                    seq_buf[t * BP:(t + 1) * BP, :] = h

        # Final Linear on the last timestep's hidden state (lane-dense store).
        out_ref[...] = jnp.dot(h[:, :H].astype(jnp.bfloat16), fc_w_ref[...],
                               preferred_element_type=jnp.float32) + fc_b_ref[...]

    return kernel


def pack_params(params, input_size):
    """Pack weights ONCE: gate-aligned, pre-transposed, bf16 matmul operands.

    Per layer: w_ih (in_dim, 3*GP) bf16, w_hh (H, 3*GP) bf16,
               b_gi (1, 3*GP) f32 (b_ih+b_hh for r/z, b_in for n),
               b_hn (1, GP)  f32 (kept separate: applied inside r*(.)).
    """
    H = int(params["hidden_size"])
    L = len(params["w_ih"])
    O = int(params["fc_b"].shape[0])
    GP, OP = GATE_PITCH, OUT_PITCH

    packed = {"hidden_size": H, "num_layers": L, "output_size": O,
              "input_size": int(input_size), "layers": []}
    for l in range(L):
        in_dim = input_size if l == 0 else H
        w_ih, w_hh = params["w_ih"][l], params["w_hh"][l]
        b_ih, b_hh = params["b_ih"][l], params["b_hh"][l]

        w_ih_p = jnp.zeros((in_dim, 3 * GP), jnp.float32)
        w_hh_p = jnp.zeros((H, 3 * GP), jnp.float32)
        for g in range(3):  # PyTorch gate order: r, z, n
            w_ih_p = w_ih_p.at[:, g * GP:g * GP + H].set(w_ih[g * H:(g + 1) * H, :].T)
            w_hh_p = w_hh_p.at[:, g * GP:g * GP + H].set(w_hh[g * H:(g + 1) * H, :].T)

        b_gi = jnp.zeros((1, 3 * GP), jnp.float32)
        b_gi = b_gi.at[0, 0 * GP:0 * GP + H].set(b_ih[0:H] + b_hh[0:H])
        b_gi = b_gi.at[0, 1 * GP:1 * GP + H].set(b_ih[H:2 * H] + b_hh[H:2 * H])
        b_gi = b_gi.at[0, 2 * GP:2 * GP + H].set(b_ih[2 * H:3 * H])
        b_hn = jnp.zeros((1, GP), jnp.float32).at[0, :H].set(b_hh[2 * H:3 * H])

        packed["layers"].append((w_ih_p.astype(jnp.bfloat16),
                                 w_hh_p.astype(jnp.bfloat16), b_gi, b_hn))

    packed["fc_w"] = (jnp.zeros((H, OP), jnp.float32)
                      .at[:, :O].set(params["fc_w"].T).astype(jnp.bfloat16))
    packed["fc_b"] = jnp.zeros((1, OP), jnp.float32).at[0, :O].set(params["fc_b"])
    # Materialize the packed arrays now (pack once, not per forward call).
    packed["layers"] = [tuple(jax.block_until_ready(a) for a in lyr)
                        for lyr in packed["layers"]]
    packed["fc_w"] = jax.block_until_ready(packed["fc_w"])
    packed["fc_b"] = jax.block_until_ready(packed["fc_b"])
    return packed


def gru_model_forward(x, packed):
    """x: (B, T, I) batch-first like PyTorch. Returns (B, output_size) f32."""
    B, T, I = x.shape
    H = packed["hidden_size"]
    L = packed["num_layers"]
    O = packed["output_size"]
    GP, OP = GATE_PITCH, OUT_PITCH
    BP = max(8, ((B + 7) // 8) * 8)     # pad batch rows to the 8-sublane tile

    # Time-major, batch-padded, flattened rows: row index = t*BP + b.
    x_tm = jnp.transpose(x, (1, 0, 2))                      # (T, B, I)
    x_tm = jnp.pad(x_tm, ((0, 0), (0, BP - B), (0, 0)))     # (T, BP, I)
    x_tm = x_tm.reshape(T * BP, I).astype(jnp.bfloat16)

    args = [x_tm]
    for lyr in packed["layers"]:
        args.extend(lyr)
    args.extend([packed["fc_w"], packed["fc_b"]])

    kernel = _make_kernel(L, T, BP, H, GP)
    vmem_spec = pl.BlockSpec(memory_space=pltpu.MemorySpace.VMEM)
    out = pl.pallas_call(
        kernel,
        out_shape=jax.ShapeDtypeStruct((BP, OP), jnp.float32),
        in_specs=[vmem_spec] * len(args),
        out_specs=vmem_spec,
        scratch_shapes=[pltpu.VMEM((T * BP, GP), jnp.float32)],  # inter-layer seq
    )(*args)
    return out[:B, :O]


def make_gru_forward(packed):
    """Jitted forward with the pre-packed weights closed over (pack once)."""
    def fwd(x):
        return gru_model_forward(x, packed)
    return jax.jit(fwd)


def gru_model_ref(x, params, cast=jnp.float32):
    """Pure-JAX reference matching PyTorch nn.GRU + nn.Linear semantics.

    cast=float32  -> exact module semantics.
    cast=bfloat16 -> mirrors the kernel's bf16 matmul operands (f32 accumulate,
                     f32 state/gates), for a tight correctness check.
    """
    B, T, I = x.shape
    H = params["hidden_size"]
    L = len(params["w_ih"])

    def mm(a, w):
        return jnp.dot(a.astype(cast), w.astype(cast),
                       preferred_element_type=jnp.float32)

    inp_seq = x.astype(jnp.float32)
    h = None
    for l in range(L):
        w_ih = params["w_ih"][l].astype(jnp.float32)
        w_hh = params["w_hh"][l].astype(jnp.float32)
        b_ih = params["b_ih"][l].astype(jnp.float32)
        b_hh = params["b_hh"][l].astype(jnp.float32)
        h = jnp.zeros((B, H), jnp.float32)
        outs = []
        for t in range(T):
            x_t = inp_seq[:, t, :]
            gi = mm(x_t, w_ih.T) + b_ih
            gh = mm(h, w_hh.T) + b_hh
            r = jax.nn.sigmoid(gi[:, 0:H] + gh[:, 0:H])
            z = jax.nn.sigmoid(gi[:, H:2 * H] + gh[:, H:2 * H])
            n = jnp.tanh(gi[:, 2 * H:3 * H] + r * gh[:, 2 * H:3 * H])
            h = (1.0 - z) * n + z * h
            outs.append(h)
        inp_seq = jnp.stack(outs, axis=1)
    return mm(h, params["fc_w"].T.astype(jnp.float32)) + params["fc_b"].astype(jnp.float32)


def init_params(key, input_size, hidden_size, num_layers, output_size):
    params = {"w_ih": [], "w_hh": [], "b_ih": [], "b_hh": [],
              "hidden_size": hidden_size}
    k = 1.0 / jnp.sqrt(hidden_size)
    for l in range(num_layers):
        in_dim = input_size if l == 0 else hidden_size
        key, k1, k2, k3, k4 = jax.random.split(key, 5)
        params["w_ih"].append(jax.random.uniform(k1, (3 * hidden_size, in_dim),
                                                 jnp.float32, -k, k))
        params["w_hh"].append(jax.random.uniform(k2, (3 * hidden_size, hidden_size),
                                                 jnp.float32, -k, k))
        params["b_ih"].append(jax.random.uniform(k3, (3 * hidden_size,),
                                                 jnp.float32, -k, k))
        params["b_hh"].append(jax.random.uniform(k4, (3 * hidden_size,),
                                                 jnp.float32, -k, k))
    key, k5, k6 = jax.random.split(key, 3)
    params["fc_w"] = jax.random.uniform(k5, (output_size, hidden_size),
                                        jnp.float32, -k, k)
    params["fc_b"] = jax.random.uniform(k6, (output_size,),
                                        jnp.float32, -k, k)
    return params


if __name__ == "__main__":
    B, T, input_size, hidden_size, num_layers, output_size = 2, 8, 16, 32, 2, 8

    key = jax.random.PRNGKey(0)
    key, kx = jax.random.split(key)
    x = jax.random.normal(kx, (B, T, input_size), jnp.float32)
    params = init_params(key, input_size, hidden_size, num_layers, output_size)

    packed = pack_params(params, input_size)   # pack weights ONCE
    forward = make_gru_forward(packed)         # jitted forward, weights closed over

    out = jax.block_until_ready(forward(x))
    assert out.shape == (B, output_size)

    # Tight check against a reference that mirrors the kernel's bf16 matmul
    # operands (validates the kernel math / packing / t==0 shortcut exactly).
    ref_bf16 = gru_model_ref(x, params, cast=jnp.bfloat16)
    err_bf16 = jnp.max(jnp.abs(out - ref_bf16))
    assert jnp.allclose(out, ref_bf16, atol=1e-3, rtol=1e-3), (
        f"bf16-matched ref mismatch, max abs err {err_bf16}")

    # Looser check against the exact f32 module semantics (bf16-weight error).
    ref_f32 = gru_model_ref(x, params, cast=jnp.float32)
    err_f32 = jnp.max(jnp.abs(out - ref_f32))
    assert jnp.allclose(out, ref_f32, atol=5e-2, rtol=5e-2), (
        f"f32 ref mismatch, max abs err {err_f32}")

    print("KERNEL_OK")
</pallas_src>

<mosaic_0001>
module attributes {stable_mosaic.version = 11 : i64} {
  func.func @kernel(%arg0: memref<64x16xbf16, #tpu.memory_space<vmem>>, %arg1: memref<16x384xbf16, #tpu.memory_space<vmem>>, %arg2: memref<32x384xbf16, #tpu.memory_space<vmem>>, %arg3: memref<1x384xf32, #tpu.memory_space<vmem>>, %arg4: memref<1x128xf32, #tpu.memory_space<vmem>>, %arg5: memref<32x384xbf16, #tpu.memory_space<vmem>>, %arg6: memref<32x384xbf16, #tpu.memory_space<vmem>>, %arg7: memref<1x384xf32, #tpu.memory_space<vmem>>, %arg8: memref<1x128xf32, #tpu.memory_space<vmem>>, %arg9: memref<32x128xbf16, #tpu.memory_space<vmem>>, %arg10: memref<1x128xf32, #tpu.memory_space<vmem>>, %arg11: memref<8x128xf32, #tpu.memory_space<vmem>>, %arg12: memref<64x128xf32, #tpu.memory_space<vmem>>) attributes {dimension_semantics = [], scalar_prefetch = 0 : i64, scratch_operands = 1 : i64, tpu.core_type = #tpu.core_type<tc>} {
    %c0 = arith.constant 0 : index
    %c0_0 = arith.constant 0 : index
    %0 = vector.load %arg0[%c0, %c0_0] : memref<64x16xbf16, #tpu.memory_space<vmem>>, vector<64x16xbf16>
    %c0_1 = arith.constant 0 : index
    %c0_2 = arith.constant 0 : index
    %1 = vector.load %arg1[%c0_1, %c0_2] : memref<16x384xbf16, #tpu.memory_space<vmem>>, vector<16x384xbf16>
    %cst = arith.constant dense<0.000000e+00> : vector<64x384xf32>
    %2 = tpu.matmul %0, %1, %cst {dimension_numbers = #tpu.dot_dimension_numbers<[1], [0], [0], [1], [0, 0, 1, 1], [], []>} : vector<64x16xbf16>, vector<16x384xbf16>, vector<64x384xf32> -> vector<64x384xf32>
    %c0_3 = arith.constant 0 : index
    %c0_4 = arith.constant 0 : index
    %3 = vector.load %arg3[%c0_3, %c0_4] : memref<1x384xf32, #tpu.memory_space<vmem>>, vector<1x384xf32>
    %4 = vector.broadcast %3 : vector<1x384xf32> to vector<64x384xf32>
    %5 = arith.addf %2, %4 : vector<64x384xf32>
    %c0_5 = arith.constant 0 : index
    %c0_6 = arith.constant 0 : index
    %6 = vector.load %arg2[%c0_5, %c0_6] : memref<32x384xbf16, #tpu.memory_space<vmem>>, vector<32x384xbf16>
    %c0_7 = arith.constant 0 : index
    %c0_8 = arith.constant 0 : index
    %7 = vector.load %arg4[%c0_7, %c0_8] : memref<1x128xf32, #tpu.memory_space<vmem>>, vector<1x128xf32>
    %8 = vector.shape_cast %7 : vector<1x128xf32> to vector<1x128xf32>
    %9 = vector.broadcast %8 : vector<1x128xf32> to vector<8x128xf32>
    %10 = vector.extract_strided_slice %5 {offsets = [0, 0], sizes = [8, 384], strides = [1, 1]} : vector<64x384xf32> to vector<8x384xf32>
    %11 = vector.extract_strided_slice %10 {offsets = [0, 0], sizes = [8, 256], strides = [1, 1]} : vector<8x384xf32> to vector<8x256xf32>
    %cst_9 = arith.constant 5.000000e-01 : f32
    %12 = vector.broadcast %cst_9 : f32 to vector<8x256xf32>
    %13 = arith.mulf %12, %11 : vector<8x256xf32>
    %14 = math.tanh %13 : vector<8x256xf32>
    %cst_10 = arith.constant 5.000000e-01 : f32
    %15 = vector.broadcast %cst_10 : f32 to vector<8x256xf32>
    %16 = arith.mulf %15, %14 : vector<8x256xf32>
    %cst_11 = arith.constant 5.000000e-01 : f32
    %17 = vector.broadcast %cst_11 : f32 to vector<8x256xf32>
    %18 = arith.addf %16, %17 : vector<8x256xf32>
    %19 = vector.extract_strided_slice %18 {offsets = [0, 0], sizes = [8, 128], strides = [1, 1]} : vector<8x256xf32> to vector<8x128xf32>
    %20 = vector.extract_strided_slice %18 {offsets = [0, 128], sizes = [8, 128], strides = [1, 1]} : vector<8x256xf32> to vector<8x128xf32>
    %21 = vector.extract_strided_slice %10 {offsets = [0, 256], sizes = [8, 128], strides = [1, 1]} : vector<8x384xf32> to vector<8x128xf32>
    %22 = arith.mulf %19, %9 : vector<8x128xf32>
    %23 = arith.addf %21, %22 : vector<8x128xf32>
    %24 = math.tanh %23 : vector<8x128xf32>
    %cst_12 = arith.constant 1.000000e+00 : f32
    %25 = vector.broadcast %cst_12 : f32 to vector<8x128xf32>
    %26 = arith.subf %25, %20 : vector<8x128xf32>
    %27 = arith.mulf %26, %24 : vector<8x128xf32>
    %c0_13 = arith.constant 0 : index
    %c0_14 = arith.constant 0 : index
    %28 = vector.load %arg12[%c0_13, %c0_14] : memref<64x128xf32, #tpu.memory_space<vmem>>, vector<8x128xf32>
    tpu.vector_store %arg12[%c0_13, %c0_14], %27 {strides = array<i32>} : memref<64x128xf32, #tpu.memory_space<vmem>>, vector<8x128xf32>,
    %29 = vector.extract_strided_slice %5 {offsets = [8, 0], sizes = [8, 384], strides = [1, 1]} : vector<64x384xf32> to vector<8x384xf32>
    %30 = vector.extract_strided_slice %27 {offsets = [0, 0], sizes = [8, 32], strides = [1, 1]} : vector<8x128xf32> to vector<8x32xf32>
    %31 = arith.truncf %30 : vector<8x32xf32> to vector<8x32xbf16>
    %cst_15 = arith.constant dense<0.000000e+00> : vector<8x384xf32>
    %32 = tpu.matmul %31, %6, %cst_15 {dimension_numbers = #tpu.dot_dimension_numbers<[1], [0], [0], [1], [0, 0, 1, 1], [], []>} : vector<8x32xbf16>, vector<32x384xbf16>, vector<8x384xf32> -> vector<8x384xf32>
    %33 = vector.extract_strided_slice %29 {offsets = [0, 0], sizes = [8, 256], strides = [1, 1]} : vector<8x384xf32> to vector<8x256xf32>
    %34 = vector.extract_strided_slice %32 {offsets = [0, 0], sizes = [8, 256], strides = [1, 1]} : vector<8x384xf32> to vector<8x256xf32>
    %35 = arith.addf %33, %34 : vector<8x256xf32>
    %cst_16 = arith.constant 5.000000e-01 : f32
    %36 = vector.broadcast %cst_16 : f32 to vector<8x256xf32>
    %37 = arith.mulf %36, %35 : vector<8x256xf32>
    %38 = math.tanh %37 : vector<8x256xf32>
    %cst_17 = arith.constant 5.000000e-01 : f32
    %39 = vector.broadcast %cst_17 : f32 to vector<8x256xf32>
    %40 = arith.mulf %39, %38 : vector<8x256xf32>
    %cst_18 = arith.constant 5.000000e-01 : f32
    %41 = vector.broadcast %cst_18 : f32 to vector<8x256xf32>
    %42 = arith.addf %40, %41 : vector<8x256xf32>
    %43 = vector.extract_strided_slice %42 {offsets = [0, 0], sizes = [8, 128], strides = [1, 1]} : vector<8x256xf32> to vector<8x128xf32>
    %44 = vector.extract_strided_slice %42 {offsets = [0, 128], sizes = [8, 128], strides = [1, 1]} : vector<8x256xf32> to vector<8x128xf32>
    %45 = vector.extract_strided_slice %29 {offsets = [0, 256], sizes = [8, 128], strides = [1, 1]} : vector<8x384xf32> to vector<8x128xf32>
    %46 = vector.extract_strided_slice %32 {offsets = [0, 256], sizes = [8, 128], strides = [1, 1]} : vector<8x384xf32> to vector<8x128xf32>
    %47 = arith.addf %46, %9 : vector<8x128xf32>
    %48 = arith.mulf %43, %47 : vector<8x128xf32>
    %49 = arith.addf %45, %48 : vector<8x128xf32>
    %50 = math.tanh %49 : vector<8x128xf32>
    %cst_19 = arith.constant 1.000000e+00 : f32
    %51 = vector.broadcast %cst_19 : f32 to vector<8x128xf32>
    %52 = arith.subf %51, %44 : vector<8x128xf32>
    %53 = arith.mulf %52, %50 : vector<8x128xf32>
    %54 = arith.mulf %44, %27 : vector<8x128xf32>
    %55 = arith.addf %53, %54 : vector<8x128xf32>
    %c8 = arith.constant 8 : index
    %c0_20 = arith.constant 0 : index
    %56 = vector.load %arg12[%c8, %c0_20] : memref<64x128xf32, #tpu.memory_space<vmem>>, vector<8x128xf32>
    tpu.vector_store %arg12[%c8, %c0_20], %55 {strides = array<i32>} : memref<64x128xf32, #tpu.memory_space<vmem>>, vector<8x128xf32>,
    %57 = vector.extract_strided_slice %5 {offsets = [16, 0], sizes = [8, 384], strides = [1, 1]} : vector<64x384xf32> to vector<8x384xf32>
    %58 = vector.extract_strided_slice %55 {offsets = [0, 0], sizes = [8, 32], strides = [1, 1]} : vector<8x128xf32> to vector<8x32xf32>
    %59 = arith.truncf %58 : vector<8x32xf32> to vector<8x32xbf16>
    %cst_21 = arith.constant dense<0.000000e+00> : vector<8x384xf32>
    %60 = tpu.matmul %59, %6, %cst_21 {dimension_numbers = #tpu.dot_dimension_numbers<[1], [0], [0], [1], [0, 0, 1, 1], [], []>} : vector<8x32xbf16>, vector<32x384xbf16>, vector<8x384xf32> -> vector<8x384xf32>
    %61 = vector.extract_strided_slice %57 {offsets = [0, 0], sizes = [8, 256], strides = [1, 1]} : vector<8x384xf32> to vector<8x256xf32>
    %62 = vector.extract_strided_slice %60 {offsets = [0, 0], sizes = [8, 256], strides = [1, 1]} : vector<8x384xf32> to vector<8x256xf32>
    %63 = arith.addf %61, %62 : vector<8x256xf32>
    %cst_22 = arith.constant 5.000000e-01 : f32
    %64 = vector.broadcast %cst_22 : f32 to vector<8x256xf32>
    %65 = arith.mulf %64, %63 : vector<8x256xf32>
    %66 = math.tanh %65 : vector<8x256xf32>
    %cst_23 = arith.constant 5.000000e-01 : f32
    %67 = vector.broadcast %cst_23 : f32 to vector<8x256xf32>
    %68 = arith.mulf %67, %66 : vector<8x256xf32>
    %cst_24 = arith.constant 5.000000e-01 : f32
    %69 = vector.broadcast %cst_24 : f32 to vector<8x256xf32>
    %70 = arith.addf %68, %69 : vector<8x256xf32>
    %71 = vector.extract_strided_slice %70 {offsets = [0, 0], sizes = [8, 128], strides = [1, 1]} : vector<8x256xf32> to vector<8x128xf32>
    %72 = vector.extract_strided_slice %70 {offsets = [0, 128], sizes = [8, 128], strides = [1, 1]} : vector<8x256xf32> to vector<8x128xf32>
    %73 = vector.extract_strided_slice %57 {offsets = [0, 256], sizes = [8, 128], strides = [1, 1]} : vector<8x384xf32> to vector<8x128xf32>
    %74 = vector.extract_strided_slice %60 {offsets = [0, 256], sizes = [8, 128], strides = [1, 1]} : vector<8x384xf32> to vector<8x128xf32>
    %75 = arith.addf %74, %9 : vector<8x128xf32>
    %76 = arith.mulf %71, %75 : vector<8x128xf32>
    %77 = arith.addf %73, %76 : vector<8x128xf32>
    %78 = math.tanh %77 : vector<8x128xf32>
    %cst_25 = arith.constant 1.000000e+00 : f32
    %79 = vector.broadcast %cst_25 : f32 to vector<8x128xf32>
    %80 = arith.subf %79, %72 : vector<8x128xf32>
    %81 = arith.mulf %80, %78 : vector<8x128xf32>
    %82 = arith.mulf %72, %55 : vector<8x128xf32>
    %83 = arith.addf %81, %82 : vector<8x128xf32>
    %c16 = arith.constant 16 : index
    %c0_26 = arith.constant 0 : index
    %84 = vector.load %arg12[%c16, %c0_26] : memref<64x128xf32, #tpu.memory_space<vmem>>, vector<8x128xf32>
    tpu.vector_store %arg12[%c16, %c0_26], %83 {strides = array<i32>} : memref<64x128xf32, #tpu.memory_space<vmem>>, vector<8x128xf32>,
    %85 = vector.extract_strided_slice %5 {offsets = [24, 0], sizes = [8, 384], strides = [1, 1]} : vector<64x384xf32> to vector<8x384xf32>
    %86 = vector.extract_strided_slice %83 {offsets = [0, 0], sizes = [8, 32], strides = [1, 1]} : vector<8x128xf32> to vector<8x32xf32>
    %87 = arith.truncf %86 : vector<8x32xf32> to vector<8x32xbf16>
    %cst_27 = arith.constant dense<0.000000e+00> : vector<8x384xf32>
    %88 = tpu.matmul %87, %6, %cst_27 {dimension_numbers = #tpu.dot_dimension_numbers<[1], [0], [0], [1], [0, 0, 1, 1], [], []>} : vector<8x32xbf16>, vector<32x384xbf16>, vector<8x384xf32> -> vector<8x384xf32>
    %89 = vector.extract_strided_slice %85 {offsets = [0, 0], sizes = [8, 256], strides = [1, 1]} : vector<8x384xf32> to vector<8x256xf32>
    %90 = vector.extract_strided_slice %88 {offsets = [0, 0], sizes = [8, 256], strides = [1, 1]} : vector<8x384xf32> to vector<8x256xf32>
    %91 = arith.addf %89, %90 : vector<8x256xf32>
    %cst_28 = arith.constant 5.000000e-01 : f32
    %92 = vector.broadcast %cst_28 : f32 to vector<8x256xf32>
    %93 = arith.mulf %92, %91 : vector<8x256xf32>
    %94 = math.tanh %93 : vector<8x256xf32>
    %cst_29 = arith.constant 5.000000e-01 : f32
    %95 = vector.broadcast %cst_29 : f32 to vector<8x256xf32>
    %96 = arith.mulf %95, %94 : vector<8x256xf32>
    %cst_30 = arith.constant 5.000000e-01 : f32
    %97 = vector.broadcast %cst_30 : f32 to vector<8x256xf32>
    %98 = arith.addf %96, %97 : vector<8x256xf32>
    %99 = vector.extract_strided_slice %98 {offsets = [0, 0], sizes = [8, 128], strides = [1, 1]} : vector<8x256xf32> to vector<8x128xf32>
    %100 = vector.extract_strided_slice %98 {offsets = [0, 128], sizes = [8, 128], strides = [1, 1]} : vector<8x256xf32> to vector<8x128xf32>
    %101 = vector.extract_strided_slice %85 {offsets = [0, 256], sizes = [8, 128], strides = [1, 1]} : vector<8x384xf32> to vector<8x128xf32>
    %102 = vector.extract_strided_slice %88 {offsets = [0, 256], sizes = [8, 128], strides = [1, 1]} : vector<8x384xf32> to vector<8x128xf32>
    %103 = arith.addf %102, %9 : vector<8x128xf32>
    %104 = arith.mulf %99, %103 : vector<8x128xf32>
    %105 = arith.addf %101, %104 : vector<8x128xf32>
    %106 = math.tanh %105 : vector<8x128xf32>
    %cst_31 = arith.constant 1.000000e+00 : f32
    %107 = vector.broadcast %cst_31 : f32 to vector<8x128xf32>
    %108 = arith.subf %107, %100 : vector<8x128xf32>
    %109 = arith.mulf %108, %106 : vector<8x128xf32>
    %110 = arith.mulf %100, %83 : vector<8x128xf32>
    %111 = arith.addf %109, %110 : vector<8x128xf32>
    %c24 = arith.constant 24 : index
    %c0_32 = arith.constant 0 : index
    %112 = vector.load %arg12[%c24, %c0_32] : memref<64x128xf32, #tpu.memory_space<vmem>>, vector<8x128xf32>
    tpu.vector_store %arg12[%c24, %c0_32], %111 {strides = array<i32>} : memref<64x128xf32, #tpu.memory_space<vmem>>, vector<8x128xf32>,
    %113 = vector.extract_strided_slice %5 {offsets = [32, 0], sizes = [8, 384], strides = [1, 1]} : vector<64x384xf32> to vector<8x384xf32>
    %114 = vector.extract_strided_slice %111 {offsets = [0, 0], sizes = [8, 32], strides = [1, 1]} : vector<8x128xf32> to vector<8x32xf32>
    %115 = arith.truncf %114 : vector<8x32xf32> to vector<8x32xbf16>
    %cst_33 = arith.constant dense<0.000000e+00> : vector<8x384xf32>
    %116 = tpu.matmul %115, %6, %cst_33 {dimension_numbers = #tpu.dot_dimension_numbers<[1], [0], [0], [1], [0, 0, 1, 1], [], []>} : vector<8x32xbf16>, vector<32x384xbf16>, vector<8x384xf32> -> vector<8x384xf32>
    %117 = vector.extract_strided_slice %113 {offsets = [0, 0], sizes = [8, 256], strides = [1, 1]} : vector<8x384xf32> to vector<8x256xf32>
    %118 = vector.extract_strided_slice %116 {offsets = [0, 0], sizes = [8, 256], strides = [1, 1]} : vector<8x384xf32> to vector<8x256xf32>
    %119 = arith.addf %117, %118 : vector<8x256xf32>
    %cst_34 = arith.constant 5.000000e-01 : f32
    %120 = vector.broadcast %cst_34 : f32 to vector<8x256xf32>
    %121 = arith.mulf %120, %119 : vector<8x256xf32>
    %122 = math.tanh %121 : vector<8x256xf32>
    %cst_35 = arith.constant 5.000000e-01 : f32
    %123 = vector.broadcast %cst_35 : f32 to vector<8x256xf32>
    %124 = arith.mulf %123, %122 : vector<8x256xf32>
    %cst_36 = arith.constant 5.000000e-01 : f32
    %125 = vector.broadcast %cst_36 : f32 to vector<8x256xf32>
    %126 = arith.addf %124, %125 : vector<8x256xf32>
    %127 = vector.extract_strided_slice %126 {offsets = [0, 0], sizes = [8, 128], strides = [1, 1]} : vector<8x256xf32> to vector<8x128xf32>
    %128 = vector.extract_strided_slice %126 {offsets = [0, 128], sizes = [8, 128], strides = [1, 1]} : vector<8x256xf32> to vector<8x128xf32>
    %129 = vector.extract_strided_slice %113 {offsets = [0, 256], sizes = [8, 128], strides = [1, 1]} : vector<8x384xf32> to vector<8x128xf32>
    %130 = vector.extract_strided_slice %116 {offsets = [0, 256], sizes = [8, 128], strides = [1, 1]} : vector<8x384xf32> to vector<8x128xf32>
    %131 = arith.addf %130, %9 : vector<8x128xf32>
    %132 = arith.mulf %127, %131 : vector<8x128xf32>
    %133 = arith.addf %129, %132 : vector<8x128xf32>
    %134 = math.tanh %133 : vector<8x128xf32>
    %cst_37 = arith.constant 1.000000e+00 : f32
    %135 = vector.broadcast %cst_37 : f32 to vector<8x128xf32>
    %136 = arith.subf %135, %128 : vector<8x128xf32>
    %137 = arith.mulf %136, %134 : vector<8x128xf32>
    %138 = arith.mulf %128, %111 : vector<8x128xf32>
    %139 = arith.addf %137, %138 : vector<8x128xf32>
    %c32 = arith.constant 32 : index
    %c0_38 = arith.constant 0 : index
    %140 = vector.load %arg12[%c32, %c0_38] : memref<64x128xf32, #tpu.memory_space<vmem>>, vector<8x128xf32>
    tpu.vector_store %arg12[%c32, %c0_38], %139 {strides = array<i32>} : memref<64x128xf32, #tpu.memory_space<vmem>>, vector<8x128xf32>,
    %141 = vector.extract_strided_slice %5 {offsets = [40, 0], sizes = [8, 384], strides = [1, 1]} : vector<64x384xf32> to vector<8x384xf32>
    %142 = vector.extract_strided_slice %139 {offsets = [0, 0], sizes = [8, 32], strides = [1, 1]} : vector<8x128xf32> to vector<8x32xf32>
    %143 = arith.truncf %142 : vector<8x32xf32> to vector<8x32xbf16>
    %cst_39 = arith.constant dense<0.000000e+00> : vector<8x384xf32>
    %144 = tpu.matmul %143, %6, %cst_39 {dimension_numbers = #tpu.dot_dimension_numbers<[1], [0], [0], [1], [0, 0, 1, 1], [], []>} : vector<8x32xbf16>, vector<32x384xbf16>, vector<8x384xf32> -> vector<8x384xf32>
    %145 = vector.extract_strided_slice %141 {offsets = [0, 0], sizes = [8, 256], strides = [1, 1]} : vector<8x384xf32> to vector<8x256xf32>
    %146 = vector.extract_strided_slice %144 {offsets = [0, 0], sizes = [8, 256], strides = [1, 1]} : vector<8x384xf32> to vector<8x256xf32>
    %147 = arith.addf %145, %146 : vector<8x256xf32>
    %cst_40 = arith.constant 5.000000e-01 : f32
    %148 = vector.broadcast %cst_40 : f32 to vector<8x256xf32>
    %149 = arith.mulf %148, %147 : vector<8x256xf32>
    %150 = math.tanh %149 : vector<8x256xf32>
    %cst_41 = arith.constant 5.000000e-01 : f32
    %151 = vector.broadcast %cst_41 : f32 to vector<8x256xf32>
    %152 = arith.mulf %151, %150 : vector<8x256xf32>
    %cst_42 = arith.constant 5.000000e-01 : f32
    %153 = vector.broadcast %cst_42 : f32 to vector<8x256xf32>
    %154 = arith.addf %152, %153 : vector<8x256xf32>
    %155 = vector.extract_strided_slice %154 {offsets = [0, 0], sizes = [8, 128], strides = [1, 1]} : vector<8x256xf32> to vector<8x128xf32>
    %156 = vector.extract_strided_slice %154 {offsets = [0, 128], sizes = [8, 128], strides = [1, 1]} : vector<8x256xf32> to vector<8x128xf32>
    %157 = vector.extract_strided_slice %141 {offsets = [0, 256], sizes = [8, 128], strides = [1, 1]} : vector<8x384xf32> to vector<8x128xf32>
    %158 = vector.extract_strided_slice %144 {offsets = [0, 256], sizes = [8, 128], strides = [1, 1]} : vector<8x384xf32> to vector<8x128xf32>
    %159 = arith.addf %158, %9 : vector<8x128xf32>
    %160 = arith.mulf %155, %159 : vector<8x128xf32>
    %161 = arith.addf %157, %160 : vector<8x128xf32>
    %162 = math.tanh %161 : vector<8x128xf32>
    %cst_43 = arith.constant 1.000000e+00 : f32
    %163 = vector.broadcast %cst_43 : f32 to vector<8x128xf32>
    %164 = arith.subf %163, %156 : vector<8x128xf32>
    %165 = arith.mulf %164, %162 : vector<8x128xf32>
    %166 = arith.mulf %156, %139 : vector<8x128xf32>
    %167 = arith.addf %165, %166 : vector<8x128xf32>
    %c40 = arith.constant 40 : index
    %c0_44 = arith.constant 0 : index
    %168 = vector.load %arg12[%c40, %c0_44] : memref<64x128xf32, #tpu.memory_space<vmem>>, vector<8x128xf32>
    tpu.vector_store %arg12[%c40, %c0_44], %167 {strides = array<i32>} : memref<64x128xf32, #tpu.memory_space<vmem>>, vector<8x128xf32>,
    %169 = vector.extract_strided_slice %5 {offsets = [48, 0], sizes = [8, 384], strides = [1, 1]} : vector<64x384xf32> to vector<8x384xf32>
    %170 = vector.extract_strided_slice %167 {offsets = [0, 0], sizes = [8, 32], strides = [1, 1]} : vector<8x128xf32> to vector<8x32xf32>
    %171 = arith.truncf %170 : vector<8x32xf32> to vector<8x32xbf16>
    %cst_45 = arith.constant dense<0.000000e+00> : vector<8x384xf32>
    %172 = tpu.matmul %171, %6, %cst_45 {dimension_numbers = #tpu.dot_dimension_numbers<[1], [0], [0], [1], [0, 0, 1, 1], [], []>} : vector<8x32xbf16>, vector<32x384xbf16>, vector<8x384xf32> -> vector<8x384xf32>
    %173 = vector.extract_strided_slice %169 {offsets = [0, 0], sizes = [8, 256], strides = [1, 1]} : vector<8x384xf32> to vector<8x256xf32>
    %174 = vector.extract_strided_slice %172 {offsets = [0, 0], sizes = [8, 256], strides = [1, 1]} : vector<8x384xf32> to vector<8x256xf32>
    %175 = arith.addf %173, %174 : vector<8x256xf32>
    %cst_46 = arith.constant 5.000000e-01 : f32
    %176 = vector.broadcast %cst_46 : f32 to vector<8x256xf32>
    %177 = arith.mulf %176, %175 : vector<8x256xf32>
    %178 = math.tanh %177 : vector<8x256xf32>
    %cst_47 = arith.constant 5.000000e-01 : f32
    %179 = vector.broadcast %cst_47 : f32 to vector<8x256xf32>
    %180 = arith.mulf %179, %178 : vector<8x256xf32>
    %cst_48 = arith.constant 5.000000e-01 : f32
    %181 = vector.broadcast %cst_48 : f32 to vector<8x256xf32>
    %182 = arith.addf %180, %181 : vector<8x256xf32>
    %183 = vector.extract_strided_slice %182 {offsets = [0, 0], sizes = [8, 128], strides = [1, 1]} : vector<8x256xf32> to vector<8x128xf32>
    %184 = vector.extract_strided_slice %182 {offsets = [0, 128], sizes = [8, 128], strides = [1, 1]} : vector<8x256xf32> to vector<8x128xf32>
    %185 = vector.extract_strided_slice %169 {offsets = [0, 256], sizes = [8, 128], strides = [1, 1]} : vector<8x384xf32> to vector<8x128xf32>
    %186 = vector.extract_strided_slice %172 {offsets = [0, 256], sizes = [8, 128], strides = [1, 1]} : vector<8x384xf32> to vector<8x128xf32>
    %187 = arith.addf %186, %9 : vector<8x128xf32>
    %188 = arith.mulf %183, %187 : vector<8x128xf32>
    %189 = arith.addf %185, %188 : vector<8x128xf32>
    %190 = math.tanh %189 : vector<8x128xf32>
    %cst_49 = arith.constant 1.000000e+00 : f32
    %191 = vector.broadcast %cst_49 : f32 to vector<8x128xf32>
    %192 = arith.subf %191, %184 : vector<8x128xf32>
    %193 = arith.mulf %192, %190 : vector<8x128xf32>
    %194 = arith.mulf %184, %167 : vector<8x128xf32>
    %195 = arith.addf %193, %194 : vector<8x128xf32>
    %c48 = arith.constant 48 : index
    %c0_50 = arith.constant 0 : index
    %196 = vector.load %arg12[%c48, %c0_50] : memref<64x128xf32, #tpu.memory_space<vmem>>, vector<8x128xf32>
    tpu.vector_store %arg12[%c48, %c0_50], %195 {strides = array<i32>} : memref<64x128xf32, #tpu.memory_space<vmem>>, vector<8x128xf32>,
    %197 = vector.extract_strided_slice %5 {offsets = [56, 0], sizes = [8, 384], strides = [1, 1]} : vector<64x384xf32> to vector<8x384xf32>
    %198 = vector.extract_strided_slice %195 {offsets = [0, 0], sizes = [8, 32], strides = [1, 1]} : vector<8x128xf32> to vector<8x32xf32>
    %199 = arith.truncf %198 : vector<8x32xf32> to vector<8x32xbf16>
    %cst_51 = arith.constant dense<0.000000e+00> : vector<8x384xf32>
    %200 = tpu.matmul %199, %6, %cst_51 {dimension_numbers = #tpu.dot_dimension_numbers<[1], [0], [0], [1], [0, 0, 1, 1], [], []>} : vector<8x32xbf16>, vector<32x384xbf16>, vector<8x384xf32> -> vector<8x384xf32>
    %201 = vector.extract_strided_slice %197 {offsets = [0, 0], sizes = [8, 256], strides = [1, 1]} : vector<8x384xf32> to vector<8x256xf32>
    %202 = vector.extract_strided_slice %200 {offsets = [0, 0], sizes = [8, 256], strides = [1, 1]} : vector<8x384xf32> to vector<8x256xf32>
    %203 = arith.addf %201, %202 : vector<8x256xf32>
    %cst_52 = arith.constant 5.000000e-01 : f32
    %204 = vector.broadcast %cst_52 : f32 to vector<8x256xf32>
    %205 = arith.mulf %204, %203 : vector<8x256xf32>
    %206 = math.tanh %205 : vector<8x256xf32>
    %cst_53 = arith.constant 5.000000e-01 : f32
    %207 = vector.broadcast %cst_53 : f32 to vector<8x256xf32>
    %208 = arith.mulf %207, %206 : vector<8x256xf32>
    %cst_54 = arith.constant 5.000000e-01 : f32
    %209 = vector.broadcast %cst_54 : f32 to vector<8x256xf32>
    %210 = arith.addf %208, %209 : vector<8x256xf32>
    %211 = vector.extract_strided_slice %210 {offsets = [0, 0], sizes = [8, 128], strides = [1, 1]} : vector<8x256xf32> to vector<8x128xf32>
    %212 = vector.extract_strided_slice %210 {offsets = [0, 128], sizes = [8, 128], strides = [1, 1]} : vector<8x256xf32> to vector<8x128xf32>
    %213 = vector.extract_strided_slice %197 {offsets = [0, 256], sizes = [8, 128], strides = [1, 1]} : vector<8x384xf32> to vector<8x128xf32>
    %214 = vector.extract_strided_slice %200 {offsets = [0, 256], sizes = [8, 128], strides = [1, 1]} : vector<8x384xf32> to vector<8x128xf32>
    %215 = arith.addf %214, %9 : vector<8x128xf32>
    %216 = arith.mulf %211, %215 : vector<8x128xf32>
    %217 = arith.addf %213, %216 : vector<8x128xf32>
    %218 = math.tanh %217 : vector<8x128xf32>
    %cst_55 = arith.constant 1.000000e+00 : f32
    %219 = vector.broadcast %cst_55 : f32 to vector<8x128xf32>
    %220 = arith.subf %219, %212 : vector<8x128xf32>
    %221 = arith.mulf %220, %218 : vector<8x128xf32>
    %222 = arith.mulf %212, %195 : vector<8x128xf32>
    %223 = arith.addf %221, %222 : vector<8x128xf32>
    %c56 = arith.constant 56 : index
    %c0_56 = arith.constant 0 : index
    %224 = vector.load %arg12[%c56, %c0_56] : memref<64x128xf32, #tpu.memory_space<vmem>>, vector<8x128xf32>
    tpu.vector_store %arg12[%c56, %c0_56], %223 {strides = array<i32>} : memref<64x128xf32, #tpu.memory_space<vmem>>, vector<8x128xf32>,
    %c0_57 = arith.constant 0 : index
    %c0_58 = arith.constant 0 : index
    %225 = vector.load %arg12[%c0_57, %c0_58] : memref<64x128xf32, #tpu.memory_space<vmem>>, vector<64x128xf32>
    %226 = vector.extract_strided_slice %225 {offsets = [0, 0], sizes = [64, 32], strides = [1, 1]} : vector<64x128xf32> to vector<64x32xf32>
    %227 = arith.truncf %226 : vector<64x32xf32> to vector<64x32xbf16>
    %c0_59 = arith.constant 0 : index
    %c0_60 = arith.constant 0 : index
    %228 = vector.load %arg5[%c0_59, %c0_60] : memref<32x384xbf16, #tpu.memory_space<vmem>>, vector<32x384xbf16>
    %cst_61 = arith.constant dense<0.000000e+00> : vector<64x384xf32>
    %229 = tpu.matmul %227, %228, %cst_61 {dimension_numbers = #tpu.dot_dimension_numbers<[1], [0], [0], [1], [0, 0, 1, 1], [], []>} : vector<64x32xbf16>, vector<32x384xbf16>, vector<64x384xf32> -> vector<64x384xf32>
    %c0_62 = arith.constant 0 : index
    %c0_63 = arith.constant 0 : index
    %230 = vector.load %arg7[%c0_62, %c0_63] : memref<1x384xf32, #tpu.memory_space<vmem>>, vector<1x384xf32>
    %231 = vector.broadcast %230 : vector<1x384xf32> to vector<64x384xf32>
    %232 = arith.addf %229, %231 : vector<64x384xf32>
    %c0_64 = arith.constant 0 : index
    %c0_65 = arith.constant 0 : index
    %233 = vector.load %arg6[%c0_64, %c0_65] : memref<32x384xbf16, #tpu.memory_space<vmem>>, vector<32x384xbf16>
    %c0_66 = arith.constant 0 : index
    %c0_67 = arith.constant 0 : index
    %234 = vector.load %arg8[%c0_66, %c0_67] : memref<1x128xf32, #tpu.memory_space<vmem>>, vector<1x128xf32>
    %235 = vector.shape_cast %234 : vector<1x128xf32> to vector<1x128xf32>
    %236 = vector.broadcast %235 : vector<1x128xf32> to vector<8x128xf32>
    %237 = vector.extract_strided_slice %232 {offsets = [0, 0], sizes = [8, 384], strides = [1, 1]} : vector<64x384xf32> to vector<8x384xf32>
    %238 = vector.extract_strided_slice %237 {offsets = [0, 0], sizes = [8, 256], strides = [1, 1]} : vector<8x384xf32> to vector<8x256xf32>
    %cst_68 = arith.constant 5.000000e-01 : f32
    %239 = vector.broadcast %cst_68 : f32 to vector<8x256xf32>
    %240 = arith.mulf %239, %238 : vector<8x256xf32>
    %241 = math.tanh %240 : vector<8x256xf32>
    %cst_69 = arith.constant 5.000000e-01 : f32
    %242 = vector.broadcast %cst_69 : f32 to vector<8x256xf32>
    %243 = arith.mulf %242, %241 : vector<8x256xf32>
    %cst_70 = arith.constant 5.000000e-01 : f32
    %244 = vector.broadcast %cst_70 : f32 to vector<8x256xf32>
    %245 = arith.addf %243, %244 : vector<8x256xf32>
    %246 = vector.extract_strided_slice %245 {offsets = [0, 0], sizes = [8, 128], strides = [1, 1]} : vector<8x256xf32> to vector<8x128xf32>
    %247 = vector.extract_strided_slice %245 {offsets = [0, 128], sizes = [8, 128], strides = [1, 1]} : vector<8x256xf32> to vector<8x128xf32>
    %248 = vector.extract_strided_slice %237 {offsets = [0, 256], sizes = [8, 128], strides = [1, 1]} : vector<8x384xf32> to vector<8x128xf32>
    %249 = arith.mulf %246, %236 : vector<8x128xf32>
    %250 = arith.addf %248, %249 : vector<8x128xf32>
    %251 = math.tanh %250 : vector<8x128xf32>
    %cst_71 = arith.constant 1.000000e+00 : f32
    %252 = vector.broadcast %cst_71 : f32 to vector<8x128xf32>
    %253 = arith.subf %252, %247 : vector<8x128xf32>
    %254 = arith.mulf %253, %251 : vector<8x128xf32>
    %255 = vector.extract_strided_slice %232 {offsets = [8, 0], sizes = [8, 384], strides = [1, 1]} : vector<64x384xf32> to vector<8x384xf32>
    %256 = vector.extract_strided_slice %254 {offsets = [0, 0], sizes = [8, 32], strides = [1, 1]} : vector<8x128xf32> to vector<8x32xf32>
    %257 = arith.truncf %256 : vector<8x32xf32> to vector<8x32xbf16>
    %cst_72 = arith.constant dense<0.000000e+00> : vector<8x384xf32>
    %258 = tpu.matmul %257, %233, %cst_72 {dimension_numbers = #tpu.dot_dimension_numbers<[1], [0], [0], [1], [0, 0, 1, 1], [], []>} : vector<8x32xbf16>, vector<32x384xbf16>, vector<8x384xf32> -> vector<8x384xf32>
    %259 = vector.extract_strided_slice %255 {offsets = [0, 0], sizes = [8, 256], strides = [1, 1]} : vector<8x384xf32> to vector<8x256xf32>
    %260 = vector.extract_strided_slice %258 {offsets = [0, 0], sizes = [8, 256], strides = [1, 1]} : vector<8x384xf32> to vector<8x256xf32>
    %261 = arith.addf %259, %260 : vector<8x256xf32>
    %cst_73 = arith.constant 5.000000e-01 : f32
    %262 = vector.broadcast %cst_73 : f32 to vector<8x256xf32>
    %263 = arith.mulf %262, %261 : vector<8x256xf32>
    %264 = math.tanh %263 : vector<8x256xf32>
    %cst_74 = arith.constant 5.000000e-01 : f32
    %265 = vector.broadcast %cst_74 : f32 to vector<8x256xf32>
    %266 = arith.mulf %265, %264 : vector<8x256xf32>
    %cst_75 = arith.constant 5.000000e-01 : f32
    %267 = vector.broadcast %cst_75 : f32 to vector<8x256xf32>
    %268 = arith.addf %266, %267 : vector<8x256xf32>
    %269 = vector.extract_strided_slice %268 {offsets = [0, 0], sizes = [8, 128], strides = [1, 1]} : vector<8x256xf32> to vector<8x128xf32>
    %270 = vector.extract_strided_slice %268 {offsets = [0, 128], sizes = [8, 128], strides = [1, 1]} : vector<8x256xf32> to vector<8x128xf32>
    %271 = vector.extract_strided_slice %255 {offsets = [0, 256], sizes = [8, 128], strides = [1, 1]} : vector<8x384xf32> to vector<8x128xf32>
    %272 = vector.extract_strided_slice %258 {offsets = [0, 256], sizes = [8, 128], strides = [1, 1]} : vector<8x384xf32> to vector<8x128xf32>
    %273 = arith.addf %272, %236 : vector<8x128xf32>
    %274 = arith.mulf %269, %273 : vector<8x128xf32>
    %275 = arith.addf %271, %274 : vector<8x128xf32>
    %276 = math.tanh %275 : vector<8x128xf32>
    %cst_76 = arith.constant 1.000000e+00 : f32
    %277 = vector.broadcast %cst_76 : f32 to vector<8x128xf32>
    %278 = arith.subf %277, %270 : vector<8x128xf32>
    %279 = arith.mulf %278, %276 : vector<8x128xf32>
    %280 = arith.mulf %270, %254 : vector<8x128xf32>
    %281 = arith.addf %279, %280 : vector<8x128xf32>
    %282 = vector.extract_strided_slice %232 {offsets = [16, 0], sizes = [8, 384], strides = [1, 1]} : vector<64x384xf32> to vector<8x384xf32>
    %283 = vector.extract_strided_slice %281 {offsets = [0, 0], sizes = [8, 32], strides = [1, 1]} : vector<8x128xf32> to vector<8x32xf32>
    %284 = arith.truncf %283 : vector<8x32xf32> to vector<8x32xbf16>
    %cst_77 = arith.constant dense<0.000000e+00> : vector<8x384xf32>
    %285 = tpu.matmul %284, %233, %cst_77 {dimension_numbers = #tpu.dot_dimension_numbers<[1], [0], [0], [1], [0, 0, 1, 1], [], []>} : vector<8x32xbf16>, vector<32x384xbf16>, vector<8x384xf32> -> vector<8x384xf32>
    %286 = vector.extract_strided_slice %282 {offsets = [0, 0], sizes = [8, 256], strides = [1, 1]} : vector<8x384xf32> to vector<8x256xf32>
    %287 = vector.extract_strided_slice %285 {offsets = [0, 0], sizes = [8, 256], strides = [1, 1]} : vector<8x384xf32> to vector<8x256xf32>
    %288 = arith.addf %286, %287 : vector<8x256xf32>
    %cst_78 = arith.constant 5.000000e-01 : f32
    %289 = vector.broadcast %cst_78 : f32 to vector<8x256xf32>
    %290 = arith.mulf %289, %288 : vector<8x256xf32>
    %291 = math.tanh %290 : vector<8x256xf32>
    %cst_79 = arith.constant 5.000000e-01 : f32
    %292 = vector.broadcast %cst_79 : f32 to vector<8x256xf32>
    %293 = arith.mulf %292, %291 : vector<8x256xf32>
    %cst_80 = arith.constant 5.000000e-01 : f32
    %294 = vector.broadcast %cst_80 : f32 to vector<8x256xf32>
    %295 = arith.addf %293, %294 : vector<8x256xf32>
    %296 = vector.extract_strided_slice %295 {offsets = [0, 0], sizes = [8, 128], strides = [1, 1]} : vector<8x256xf32> to vector<8x128xf32>
    %297 = vector.extract_strided_slice %295 {offsets = [0, 128], sizes = [8, 128], strides = [1, 1]} : vector<8x256xf32> to vector<8x128xf32>
    %298 = vector.extract_strided_slice %282 {offsets = [0, 256], sizes = [8, 128], strides = [1, 1]} : vector<8x384xf32> to vector<8x128xf32>
    %299 = vector.extract_strided_slice %285 {offsets = [0, 256], sizes = [8, 128], strides = [1, 1]} : vector<8x384xf32> to vector<8x128xf32>
    %300 = arith.addf %299, %236 : vector<8x128xf32>
    %301 = arith.mulf %296, %300 : vector<8x128xf32>
    %302 = arith.addf %298, %301 : vector<8x128xf32>
    %303 = math.tanh %302 : vector<8x128xf32>
    %cst_81 = arith.constant 1.000000e+00 : f32
    %304 = vector.broadcast %cst_81 : f32 to vector<8x128xf32>
    %305 = arith.subf %304, %297 : vector<8x128xf32>
    %306 = arith.mulf %305, %303 : vector<8x128xf32>
    %307 = arith.mulf %297, %281 : vector<8x128xf32>
    %308 = arith.addf %306, %307 : vector<8x128xf32>
    %309 = vector.extract_strided_slice %232 {offsets = [24, 0], sizes = [8, 384], strides = [1, 1]} : vector<64x384xf32> to vector<8x384xf32>
    %310 = vector.extract_strided_slice %308 {offsets = [0, 0], sizes = [8, 32], strides = [1, 1]} : vector<8x128xf32> to vector<8x32xf32>
    %311 = arith.truncf %310 : vector<8x32xf32> to vector<8x32xbf16>
    %cst_82 = arith.constant dense<0.000000e+00> : vector<8x384xf32>
    %312 = tpu.matmul %311, %233, %cst_82 {dimension_numbers = #tpu.dot_dimension_numbers<[1], [0], [0], [1], [0, 0, 1, 1], [], []>} : vector<8x32xbf16>, vector<32x384xbf16>, vector<8x384xf32> -> vector<8x384xf32>
    %313 = vector.extract_strided_slice %309 {offsets = [0, 0], sizes = [8, 256], strides = [1, 1]} : vector<8x384xf32> to vector<8x256xf32>
    %314 = vector.extract_strided_slice %312 {offsets = [0, 0], sizes = [8, 256], strides = [1, 1]} : vector<8x384xf32> to vector<8x256xf32>
    %315 = arith.addf %313, %314 : vector<8x256xf32>
    %cst_83 = arith.constant 5.000000e-01 : f32
    %316 = vector.broadcast %cst_83 : f32 to vector<8x256xf32>
    %317 = arith.mulf %316, %315 : vector<8x256xf32>
    %318 = math.tanh %317 : vector<8x256xf32>
    %cst_84 = arith.constant 5.000000e-01 : f32
    %319 = vector.broadcast %cst_84 : f32 to vector<8x256xf32>
    %320 = arith.mulf %319, %318 : vector<8x256xf32>
    %cst_85 = arith.constant 5.000000e-01 : f32
    %321 = vector.broadcast %cst_85 : f32 to vector<8x256xf32>
    %322 = arith.addf %320, %321 : vector<8x256xf32>
    %323 = vector.extract_strided_slice %322 {offsets = [0, 0], sizes = [8, 128], strides = [1, 1]} : vector<8x256xf32> to vector<8x128xf32>
    %324 = vector.extract_strided_slice %322 {offsets = [0, 128], sizes = [8, 128], strides = [1, 1]} : vector<8x256xf32> to vector<8x128xf32>
    %325 = vector.extract_strided_slice %309 {offsets = [0, 256], sizes = [8, 128], strides = [1, 1]} : vector<8x384xf32> to vector<8x128xf32>
    %326 = vector.extract_strided_slice %312 {offsets = [0, 256], sizes = [8, 128], strides = [1, 1]} : vector<8x384xf32> to vector<8x128xf32>
    %327 = arith.addf %326, %236 : vector<8x128xf32>
    %328 = arith.mulf %323, %327 : vector<8x128xf32>
    %329 = arith.addf %325, %328 : vector<8x128xf32>
    %330 = math.tanh %329 : vector<8x128xf32>
    %cst_86 = arith.constant 1.000000e+00 : f32
    %331 = vector.broadcast %cst_86 : f32 to vector<8x128xf32>
    %332 = arith.subf %331, %324 : vector<8x128xf32>
    %333 = arith.mulf %332, %330 : vector<8x128xf32>
    %334 = arith.mulf %324, %308 : vector<8x128xf32>
    %335 = arith.addf %333, %334 : vector<8x128xf32>
    %336 = vector.extract_strided_slice %232 {offsets = [32, 0], sizes = [8, 384], strides = [1, 1]} : vector<64x384xf32> to vector<8x384xf32>
    %337 = vector.extract_strided_slice %335 {offsets = [0, 0], sizes = [8, 32], strides = [1, 1]} : vector<8x128xf32> to vector<8x32xf32>
    %338 = arith.truncf %337 : vector<8x32xf32> to vector<8x32xbf16>
    %cst_87 = arith.constant dense<0.000000e+00> : vector<8x384xf32>
    %339 = tpu.matmul %338, %233, %cst_87 {dimension_numbers = #tpu.dot_dimension_numbers<[1], [0], [0], [1], [0, 0, 1, 1], [], []>} : vector<8x32xbf16>, vector<32x384xbf16>, vector<8x384xf32> -> vector<8x384xf32>
    %340 = vector.extract_strided_slice %336 {offsets = [0, 0], sizes = [8, 256], strides = [1, 1]} : vector<8x384xf32> to vector<8x256xf32>
    %341 = vector.extract_strided_slice %339 {offsets = [0, 0], sizes = [8, 256], strides = [1, 1]} : vector<8x384xf32> to vector<8x256xf32>
    %342 = arith.addf %340, %341 : vector<8x256xf32>
    %cst_88 = arith.constant 5.000000e-01 : f32
    %343 = vector.broadcast %cst_88 : f32 to vector<8x256xf32>
    %344 = arith.mulf %343, %342 : vector<8x256xf32>
    %345 = math.tanh %344 : vector<8x256xf32>
    %cst_89 = arith.constant 5.000000e-01 : f32
    %346 = vector.broadcast %cst_89 : f32 to vector<8x256xf32>
    %347 = arith.mulf %346, %345 : vector<8x256xf32>
    %cst_90 = arith.constant 5.000000e-01 : f32
    %348 = vector.broadcast %cst_90 : f32 to vector<8x256xf32>
    %349 = arith.addf %347, %348 : vector<8x256xf32>
    %350 = vector.extract_strided_slice %349 {offsets = [0, 0], sizes = [8, 128], strides = [1, 1]} : vector<8x256xf32> to vector<8x128xf32>
    %351 = vector.extract_strided_slice %349 {offsets = [0, 128], sizes = [8, 128], strides = [1, 1]} : vector<8x256xf32> to vector<8x128xf32>
    %352 = vector.extract_strided_slice %336 {offsets = [0, 256], sizes = [8, 128], strides = [1, 1]} : vector<8x384xf32> to vector<8x128xf32>
    %353 = vector.extract_strided_slice %339 {offsets = [0, 256], sizes = [8, 128], strides = [1, 1]} : vector<8x384xf32> to vector<8x128xf32>
    %354 = arith.addf %353, %236 : vector<8x128xf32>
    %355 = arith.mulf %350, %354 : vector<8x128xf32>
    %356 = arith.addf %352, %355 : vector<8x128xf32>
    %357 = math.tanh %356 : vector<8x128xf32>
    %cst_91 = arith.constant 1.000000e+00 : f32
    %358 = vector.broadcast %cst_91 : f32 to vector<8x128xf32>
    %359 = arith.subf %358, %351 : vector<8x128xf32>
    %360 = arith.mulf %359, %357 : vector<8x128xf32>
    %361 = arith.mulf %351, %335 : vector<8x128xf32>
    %362 = arith.addf %360, %361 : vector<8x128xf32>
    %363 = vector.extract_strided_slice %232 {offsets = [40, 0], sizes = [8, 384], strides = [1, 1]} : vector<64x384xf32> to vector<8x384xf32>
    %364 = vector.extract_strided_slice %362 {offsets = [0, 0], sizes = [8, 32], strides = [1, 1]} : vector<8x128xf32> to vector<8x32xf32>
    %365 = arith.truncf %364 : vector<8x32xf32> to vector<8x32xbf16>
    %cst_92 = arith.constant dense<0.000000e+00> : vector<8x384xf32>
    %366 = tpu.matmul %365, %233, %cst_92 {dimension_numbers = #tpu.dot_dimension_numbers<[1], [0], [0], [1], [0, 0, 1, 1], [], []>} : vector<8x32xbf16>, vector<32x384xbf16>, vector<8x384xf32> -> vector<8x384xf32>
    %367 = vector.extract_strided_slice %363 {offsets = [0, 0], sizes = [8, 256], strides = [1, 1]} : vector<8x384xf32> to vector<8x256xf32>
    %368 = vector.extract_strided_slice %366 {offsets = [0, 0], sizes = [8, 256], strides = [1, 1]} : vector<8x384xf32> to vector<8x256xf32>
    %369 = arith.addf %367, %368 : vector<8x256xf32>
    %cst_93 = arith.constant 5.000000e-01 : f32
    %370 = vector.broadcast %cst_93 : f32 to vector<8x256xf32>
    %371 = arith.mulf %370, %369 : vector<8x256xf32>
    %372 = math.tanh %371 : vector<8x256xf32>
    %cst_94 = arith.constant 5.000000e-01 : f32
    %373 = vector.broadcast %cst_94 : f32 to vector<8x256xf32>
    %374 = arith.mulf %373, %372 : vector<8x256xf32>
    %cst_95 = arith.constant 5.000000e-01 : f32
    %375 = vector.broadcast %cst_95 : f32 to vector<8x256xf32>
    %376 = arith.addf %374, %375 : vector<8x256xf32>
    %377 = vector.extract_strided_slice %376 {offsets = [0, 0], sizes = [8, 128], strides = [1, 1]} : vector<8x256xf32> to vector<8x128xf32>
    %378 = vector.extract_strided_slice %376 {offsets = [0, 128], sizes = [8, 128], strides = [1, 1]} : vector<8x256xf32> to vector<8x128xf32>
    %379 = vector.extract_strided_slice %363 {offsets = [0, 256], sizes = [8, 128], strides = [1, 1]} : vector<8x384xf32> to vector<8x128xf32>
    %380 = vector.extract_strided_slice %366 {offsets = [0, 256], sizes = [8, 128], strides = [1, 1]} : vector<8x384xf32> to vector<8x128xf32>
    %381 = arith.addf %380, %236 : vector<8x128xf32>
    %382 = arith.mulf %377, %381 : vector<8x128xf32>
    %383 = arith.addf %379, %382 : vector<8x128xf32>
    %384 = math.tanh %383 : vector<8x128xf32>
    %cst_96 = arith.constant 1.000000e+00 : f32
    %385 = vector.broadcast %cst_96 : f32 to vector<8x128xf32>
    %386 = arith.subf %385, %378 : vector<8x128xf32>
    %387 = arith.mulf %386, %384 : vector<8x128xf32>
    %388 = arith.mulf %378, %362 : vector<8x128xf32>
    %389 = arith.addf %387, %388 : vector<8x128xf32>
    %390 = vector.extract_strided_slice %232 {offsets = [48, 0], sizes = [8, 384], strides = [1, 1]} : vector<64x384xf32> to vector<8x384xf32>
    %391 = vector.extract_strided_slice %389 {offsets = [0, 0], sizes = [8, 32], strides = [1, 1]} : vector<8x128xf32> to vector<8x32xf32>
    %392 = arith.truncf %391 : vector<8x32xf32> to vector<8x32xbf16>
    %cst_97 = arith.constant dense<0.000000e+00> : vector<8x384xf32>
    %393 = tpu.matmul %392, %233, %cst_97 {dimension_numbers = #tpu.dot_dimension_numbers<[1], [0], [0], [1], [0, 0, 1, 1], [], []>} : vector<8x32xbf16>, vector<32x384xbf16>, vector<8x384xf32> -> vector<8x384xf32>
    %394 = vector.extract_strided_slice %390 {offsets = [0, 0], sizes = [8, 256], strides = [1, 1]} : vector<8x384xf32> to vector<8x256xf32>
    %395 = vector.extract_strided_slice %393 {offsets = [0, 0], sizes = [8, 256], strides = [1, 1]} : vector<8x384xf32> to vector<8x256xf32>
    %396 = arith.addf %394, %395 : vector<8x256xf32>
    %cst_98 = arith.constant 5.000000e-01 : f32
    %397 = vector.broadcast %cst_98 : f32 to vector<8x256xf32>
    %398 = arith.mulf %397, %396 : vector<8x256xf32>
    %399 = math.tanh %398 : vector<8x256xf32>
    %cst_99 = arith.constant 5.000000e-01 : f32
    %400 = vector.broadcast %cst_99 : f32 to vector<8x256xf32>
    %401 = arith.mulf %400, %399 : vector<8x256xf32>
    %cst_100 = arith.constant 5.000000e-01 : f32
    %402 = vector.broadcast %cst_100 : f32 to vector<8x256xf32>
    %403 = arith.addf %401, %402 : vector<8x256xf32>
    %404 = vector.extract_strided_slice %403 {offsets = [0, 0], sizes = [8, 128], strides = [1, 1]} : vector<8x256xf32> to vector<8x128xf32>
    %405 = vector.extract_strided_slice %403 {offsets = [0, 128], sizes = [8, 128], strides = [1, 1]} : vector<8x256xf32> to vector<8x128xf32>
    %406 = vector.extract_strided_slice %390 {offsets = [0, 256], sizes = [8, 128], strides = [1, 1]} : vector<8x384xf32> to vector<8x128xf32>
    %407 = vector.extract_strided_slice %393 {offsets = [0, 256], sizes = [8, 128], strides = [1, 1]} : vector<8x384xf32> to vector<8x128xf32>
    %408 = arith.addf %407, %236 : vector<8x128xf32>
    %409 = arith.mulf %404, %408 : vector<8x128xf32>
    %410 = arith.addf %406, %409 : vector<8x128xf32>
    %411 = math.tanh %410 : vector<8x128xf32>
    %cst_101 = arith.constant 1.000000e+00 : f32
    %412 = vector.broadcast %cst_101 : f32 to vector<8x128xf32>
    %413 = arith.subf %412, %405 : vector<8x128xf32>
    %414 = arith.mulf %413, %411 : vector<8x128xf32>
    %415 = arith.mulf %405, %389 : vector<8x128xf32>
    %416 = arith.addf %414, %415 : vector<8x128xf32>
    %417 = vector.extract_strided_slice %232 {offsets = [56, 0], sizes = [8, 384], strides = [1, 1]} : vector<64x384xf32> to vector<8x384xf32>
    %418 = vector.extract_strided_slice %416 {offsets = [0, 0], sizes = [8, 32], strides = [1, 1]} : vector<8x128xf32> to vector<8x32xf32>
    %419 = arith.truncf %418 : vector<8x32xf32> to vector<8x32xbf16>
    %cst_102 = arith.constant dense<0.000000e+00> : vector<8x384xf32>
    %420 = tpu.matmul %419, %233, %cst_102 {dimension_numbers = #tpu.dot_dimension_numbers<[1], [0], [0], [1], [0, 0, 1, 1], [], []>} : vector<8x32xbf16>, vector<32x384xbf16>, vector<8x384xf32> -> vector<8x384xf32>
    %421 = vector.extract_strided_slice %417 {offsets = [0, 0], sizes = [8, 256], strides = [1, 1]} : vector<8x384xf32> to vector<8x256xf32>
    %422 = vector.extract_strided_slice %420 {offsets = [0, 0], sizes = [8, 256], strides = [1, 1]} : vector<8x384xf32> to vector<8x256xf32>
    %423 = arith.addf %421, %422 : vector<8x256xf32>
    %cst_103 = arith.constant 5.000000e-01 : f32
    %424 = vector.broadcast %cst_103 : f32 to vector<8x256xf32>
    %425 = arith.mulf %424, %423 : vector<8x256xf32>
    %426 = math.tanh %425 : vector<8x256xf32>
    %cst_104 = arith.constant 5.000000e-01 : f32
    %427 = vector.broadcast %cst_104 : f32 to vector<8x256xf32>
    %428 = arith.mulf %427, %426 : vector<8x256xf32>
    %cst_105 = arith.constant 5.000000e-01 : f32
    %429 = vector.broadcast %cst_105 : f32 to vector<8x256xf32>
    %430 = arith.addf %428, %429 : vector<8x256xf32>
    %431 = vector.extract_strided_slice %430 {offsets = [0, 0], sizes = [8, 128], strides = [1, 1]} : vector<8x256xf32> to vector<8x128xf32>
    %432 = vector.extract_strided_slice %430 {offsets = [0, 128], sizes = [8, 128], strides = [1, 1]} : vector<8x256xf32> to vector<8x128xf32>
    %433 = vector.extract_strided_slice %417 {offsets = [0, 256], sizes = [8, 128], strides = [1, 1]} : vector<8x384xf32> to vector<8x128xf32>
    %434 = vector.extract_strided_slice %420 {offsets = [0, 256], sizes = [8, 128], strides = [1, 1]} : vector<8x384xf32> to vector<8x128xf32>
    %435 = arith.addf %434, %236 : vector<8x128xf32>
    %436 = arith.mulf %431, %435 : vector<8x128xf32>
    %437 = arith.addf %433, %436 : vector<8x128xf32>
    %438 = math.tanh %437 : vector<8x128xf32>
    %cst_106 = arith.constant 1.000000e+00 : f32
    %439 = vector.broadcast %cst_106 : f32 to vector<8x128xf32>
    %440 = arith.subf %439, %432 : vector<8x128xf32>
    %441 = arith.mulf %440, %438 : vector<8x128xf32>
    %442 = arith.mulf %432, %416 : vector<8x128xf32>
    %443 = arith.addf %441, %442 : vector<8x128xf32>
    %444 = vector.extract_strided_slice %443 {offsets = [0, 0], sizes = [8, 32], strides = [1, 1]} : vector<8x128xf32> to vector<8x32xf32>
    %445 = arith.truncf %444 : vector<8x32xf32> to vector<8x32xbf16>
    %c0_107 = arith.constant 0 : index
    %c0_108 = arith.constant 0 : index
    %446 = vector.load %arg9[%c0_107, %c0_108] : memref<32x128xbf16, #tpu.memory_space<vmem>>, vector<32x128xbf16>
    %cst_109 = arith.constant dense<0.000000e+00> : vector<8x128xf32>
    %447 = tpu.matmul %445, %446, %cst_109 {dimension_numbers = #tpu.dot_dimension_numbers<[1], [0], [0], [1], [0, 0, 1, 1], [], []>} : vector<8x32xbf16>, vector<32x128xbf16>, vector<8x128xf32> -> vector<8x128xf32>
    %c0_110 = arith.constant 0 : index
    %c0_111 = arith.constant 0 : index
    %448 = vector.load %arg10[%c0_110, %c0_111] : memref<1x128xf32, #tpu.memory_space<vmem>>, vector<1x128xf32>
    %449 = vector.broadcast %448 : vector<1x128xf32> to vector<8x128xf32>
    %450 = arith.addf %447, %449 : vector<8x128xf32>
    %c0_112 = arith.constant 0 : index
    %c0_113 = arith.constant 0 : index
    %451 = vector.load %arg11[%c0_112, %c0_113] : memref<8x128xf32, #tpu.memory_space<vmem>>, vector<8x128xf32>
    tpu.vector_store %arg11[%c0_112, %c0_113], %450 {strides = array<i32>} : memref<8x128xf32, #tpu.memory_space<vmem>>, vector<8x128xf32>,
    return
  }
}

</mosaic_0001>

<bundles_post_ra>
// kernel: fwd.1
= control target key start
LH: loop header
LB: loop body
LE: loop exit
PB: predicated region body
PF: predicated region fallthrough
CT: control target
= control target key end

     0   :  { %16 = vsyncpa [#allocation4], 0  ;;  %s2442_s0 = inlined_call_operand.vmem [shape: bf16[64,16], index: 0, kind: input, shape index: {}]   ;;  %s2443_s1 = inlined_call_operand.vmem [shape: bf16[16,384], index: 1, kind: input, shape index: {}]   ;;  %s2444_s2 = inlined_call_operand.hbm [shape: bf16[32,384], index: 2, kind: input, shape index: {}]   ;;  %s2445_s3 = inlined_call_operand.hbm [shape: f32[1,384], index: 3, kind: input, shape index: {}]   ;;  %s2446_s4 = inlined_call_operand.hbm [shape: f32[1,128], index: 4, kind: input, shape index: {}]   ;;  %s2447_s5 = inlined_call_operand.hbm [shape: bf16[32,384], index: 5, kind: input, shape index: {}]   ;;  %s2448_s6 = inlined_call_operand.vmem [shape: bf16[32,384], index: 6, kind: input, shape index: {}]   ;;  %s2449_s7 = inlined_call_operand.hbm [shape: f32[1,384], index: 7, kind: input, shape index: {}]   ;;  %s2450_s8 = inlined_call_operand.hbm [shape: f32[1,128], index: 8, kind: input, shape index: {}]   ;;  %s2451_s9 = inlined_call_operand.vmem [shape: bf16[32,128], index: 9, kind: input, shape index: {}]   ;;  %s2452_s10 = inlined_call_operand.vmem [shape: f32[1,128], index: 10, kind: input, shape index: {}]   ;;  %s2453_s11 = inlined_call_operand.vmem [shape: f32[8,128], index: 11, kind: output, shape index: {}]  }
   0x1   :  { %17 = vsyncpa [#allocation6], 0 }
   0x2   :  { %18 = vsyncpa [#allocation9], 0  ;;  %s42_s19 = sshll.u32 %s2445_s3, 4  ;;  %s43_s19 = int_to_ptr.hbm [resolvable:$true] %s42_s19 }
   0x3   :  { %19 = vsyncpa [#allocation12], 0  ;;  %s1924_s20 = smov [#allocation5]   ;;  %s63_s24 = sshll.u32 %s2447_s5, 4  ;;  %s64_s24 = int_to_ptr.hbm [resolvable:$true] %s63_s24 }
   0x4   :  { %s44_s21 = sshll.u32 %s1924_s20, 4  ;;  %s1925_s25 = smov [#allocation8]   ;;  %s45_s21 = int_to_ptr.vmem [resolvable:$true] %s44_s21 }
   0x5   :  { %47 = dma.hbm_to_vmem [thread:$0]  %s43_s19, 48, %s45_s21, [#allocation6]  }
   0x6   :  { %s65_s26 = sshll.u32 %s1925_s25, 4  ;;  %s28_s29 = sshll.u32 %s2444_s2, 4  ;;  %s66_s26 = int_to_ptr.vmem [resolvable:$true] %s65_s26  ;;  %s29_s29 = int_to_ptr.hbm [resolvable:$true] %s28_s29 }
   0x7   :  { %s1926_s3 = smov 192   ;;  %s1927_s30 = smov 12  }
   0x8   :  { %71 = dma.hbm_to_vmem [thread:$0]  %s64_s24, 768, %s66_s26, [#allocation9], %s1926_s3, %s1926_s3, %s1927_s30  }
   0x9   :  { %s53_s14 = sshll.u32 %s2446_s4, 4  ;;  %s1928_s15 = smov [#allocation3]   ;;  %s54_s14 = int_to_ptr.hbm [resolvable:$true] %s53_s14 }
   0xa   :  { %s30_s16 = sshll.u32 %s1928_s15, 4  ;;  %s1929_s5 = smov [#allocation7]   ;;  %s31_s16 = int_to_ptr.vmem [resolvable:$true] %s30_s16 }
   0xb   :  { %36 = dma.hbm_to_vmem [thread:$0]  %s29_s29, 768, %s31_s16, [#allocation4], %s1926_s3, %s1926_s3, %s1927_s30  }
   0xc   :  { %s55_s17 = sshll.u32 %s1929_s5, 4  ;;  %s79_s2 = sshll.u32 %s2449_s7, 4  ;;  %s56_s17 = int_to_ptr.vmem [resolvable:$true] %s55_s17  ;;  %s80_s2 = int_to_ptr.hbm [resolvable:$true] %s79_s2 }
   0xd   :  { %58 = dma.hbm_to_vmem [thread:$0]  %s54_s14, 16, %s56_s17, [#allocation6]  }
   0xe   :  { %s90_s22 = sshll.u32 %s2450_s8, 4  ;;  %s1930_s23 = smov [#allocation10]   ;;  %s91_s22 = int_to_ptr.hbm [resolvable:$true] %s90_s22 }
   0xf   :  { %s81_s4 = sshll.u32 %s1930_s23, 4  ;;  %s1931_s24 = smov [#allocation11]   ;;  %s82_s4 = int_to_ptr.vmem [resolvable:$true] %s81_s4 }
  0x10   :  { %84 = dma.hbm_to_vmem [thread:$0]  %s80_s2, 48, %s82_s4, [#allocation9]  }
  0x11   :  { %s92_s25 = sshll.u32 %s1931_s24, 4  ;;  %s93_s25 = int_to_ptr.vmem [resolvable:$true] %s92_s25 }
  0x12   :  { %95 = dma.hbm_to_vmem [thread:$0]  %s91_s22, 16, %s93_s25, [#allocation12]  }
  0x13   :  { %1916 = dma.done.wait [#allocation4], 768  }
  0x14   :  { %1917 = vsyncadd [#allocation4], 4294966528 }
  0x15   :  { %1918 = dma.done.wait [#allocation6], 64  }
  0x16   :  { %1919 = vsyncadd [#allocation6], 4294967232 }
  0x17   :  { %1920 = dma.done.wait [#allocation9], 816  }
  0x18   :  { %1921 = vsyncadd [#allocation9], 4294966480 }
  0x19   :  { %1922 = dma.done.wait [#allocation12], 16  }
  0x1a   :  { %1923 = vsyncadd [#allocation12], 4294967280  ;;  %v1481_v0 = vld [vmem:[%s2443_s1] sm:$0xf]  ;;  %v1643_v1 = vld [vmem:[%s2443_s1 + $0x8] sm:$0xf0] }
  0x1b   :  { %v1642_v2 = vld [vmem:[%s2443_s1 + $0x4] sm:$0xf]  ;;  %v1482_v3 = vor.u32 %v1643_v1, %v1481_v0  ;;  %v1483_v4 = vld [vmem:[%s2443_s1 + $0xc] sm:$0xf0]  ;;  %v1489_v5 = vld [vmem:[%s2443_s1 + $0x8] sm:$0xf] }
  0x1c   :  { %v1644_v6 = vld [vmem:[%s2443_s1 + $0x10] sm:$0xf0]  ;;  %v1486_v7 = vor.u32 %v1642_v2, %v1483_v4  ;;  %v1638_v9 = vld [vmem:[%s2442_s0] sm:$0xff]  ;;  %vm181_vm0 = vcmask 130048   ;;  %v1517_v10 = vld [vmem:[#allocation3 + $0x18] sm:$0xf] }
  0x1d   :  { %v1490_v8 = vor.u32 %v1644_v6, %v1489_v5  ;;  %201 = vmatpush.bf16.msra.mxu0 %v1482_v3  ;;  %v1649_v11 = vld [vmem:[#allocation3 + $0x20] sm:$0xf0]  ;;  %v1505_v12 = vld [vmem:[#allocation3] sm:$0xf]  ;;  %v1646_v14 = vld [vmem:[#allocation3 + $0x8] sm:$0xf0] }
  0x1e   :  { %230 = vmatpush.bf16.msra.mxu1 %v1486_v7  ;;  %v2034_v13 = vor.u32 %v1649_v11, %v1517_v10  ;;  %v2037_v15 = vor.u32 %v1646_v14, %v1505_v12  ;;  %v137_v16 = vld [vmem:[#allocation5] sm:$0x7]  ;;  %v1648_v19 = vld [vmem:[#allocation3 + $0x1c] sm:$0xf]  ;;  %v1519_v20 = vld [vmem:[#allocation3 + $0x24] sm:$0xf0] }
  0x1f   :  { %259 = vmatpush.bf16.msra.mxu2 %v1490_v8  ;;  %v2042_v17 = vperm.slane %v137_v16, 0  ;;  %v2044_v18 = vperm.slane %v137_v16, 1  ;;  %v1645_v21 = vld [vmem:[#allocation3 + $0x4] sm:$0xf]  ;;  %v2046_v23 = vor.u32 %v1648_v19, %v1519_v20  ;;  %v1507_v24 = vld [vmem:[#allocation3 + $0xc] sm:$0xf0] }
  0x20   :  { %1491 = vmatmul.msk.bf16.vlgmr.msra.gmra.mxu0 %vm181_vm0, %v1638_v9  ;;  %350 = vmatpush.bf16.msra.mxu3 %v2034_v13  ;;  %v2051_v28 = vor.u32 %v1645_v21, %v1507_v24  ;;  %v2058_v31 = vperm.slane %v137_v16, 2  ;;  %v2060_v35 = vld [vmem:[#allocation7] ss:$0 sm:$0xff]  ;;  %v1525_v40 = vld [vmem:[#allocation3 + $0x20] sm:$0xf]  ;;  %vm340_vm1 = vcmask 261120  }
  0x21   :  { %1495 = vmatmul.msk.bf16.vlgmr.msra.gmra.mxu1 %vm181_vm0, %v1638_v9  ;;  %425 = vmatpush.bf16.msrb.mxu0 %v2046_v23  ;;  %v1650_v41 = vld [vmem:[#allocation3 + $0x28] sm:$0xf0]  ;;  %v1513_v44 = vld [vmem:[#allocation3 + $0x8] sm:$0xf]  ;;  %v1647_v45 = vld [vmem:[#allocation3 + $0x10] sm:$0xf0] }
  0x22   :  { %1499 = vmatmul.msk.bf16.vlgmr.msra.gmra.mxu2 %vm181_vm0, %v1638_v9  ;;  %v2064_v43 = vor.u32 %v1650_v41, %v1525_v40  ;;  %v2068_v48 = vor.u32 %v1647_v45, %v1513_v44  ;;  %v1639_v53 = vld [vmem:[%s2442_s0 + $0x8] sm:$0xff]  ;;  %v1640_v54 = vld [vmem:[%s2442_s0 + $0x10] sm:$0xff]  ;;  %v1641_v56 = vld [vmem:[%s2442_s0 + $0x18] sm:$0xff] }
  0x23   :  { %474 = vmatpush.bf16.msrb.mxu2 %v2034_v13 }
  0x24   :  { %351 = vmatpush.bf16.msra.mxu3 %v2037_v15  ;;  %438 = vmatpush.bf16.msrb.mxu1 %v2064_v43 }
  0x25   :  { %426 = vmatpush.bf16.msrb.mxu0 %v2051_v28 }
  0x27   :  { %475 = vmatpush.bf16.msrb.mxu2 %v2037_v15 }
  0x28   :  { %363 = vmatpush.bf16.msrb.mxu3 %v2046_v23  ;;  %439 = vmatpush.bf16.msrb.mxu1 %v2068_v48 }
  0x29   :  { %500 = vmatpush.bf16.msra.mxu0 %v2064_v43 }
  0x2b   :  { %549 = vmatpush.bf16.msra.mxu2 %v2046_v23 }
  0x2c   :  { %364 = vmatpush.bf16.msrb.mxu3 %v2051_v28  ;;  %536 = vmatpush.bf16.msra.mxu1 %v2034_v13 }
  0x2d   :  { %501 = vmatpush.bf16.msra.mxu0 %v2068_v48 }
  0x2f   :  { %550 = vmatpush.bf16.msra.mxu2 %v2051_v28 }
  0x30   :  { %537 = vmatpush.bf16.msra.mxu1 %v2037_v15  ;;  %1492 = vmatmul.msk.bf16.gmra.mxu0 %vm181_vm0, %v1639_v53 }
  0x31   :  { %1496 = vmatmul.msk.bf16.gmra.mxu1 %vm181_vm0, %v1639_v53 }
  0x32   :  { %1500 = vmatmul.msk.bf16.gmra.mxu2 %vm181_vm0, %v1639_v53 }
  0x40   :  { %1493 = vmatmul.msk.bf16.gmra.mxu0 %vm181_vm0, %v1640_v54 }
  0x41   :  { %1497 = vmatmul.msk.bf16.gmra.mxu1 %vm181_vm0, %v1640_v54 }
  0x42   :  { %1501 = vmatmul.msk.bf16.gmra.mxu2 %vm181_vm0, %v1640_v54 }
  0x50   :  { %1494 = vmatmul.msk.bf16.gmra.mxu0 %vm181_vm0, %v1641_v56 }
  0x51   :  { %1498 = vmatmul.msk.bf16.gmra.mxu1 %vm181_vm0, %v1641_v56 }
  0x52   :  { %1502 = vmatmul.msk.bf16.gmra.mxu2 %vm181_vm0, %v1641_v56 }
  0x9d   :  { %v203_v22 = vpop.f32.mrf.mxu0 }
  0x9e   :  { %v204_v25 = vadd.f32 %v203_v22, %v2042_v17  ;;  %v232_v26 = vpop.f32.mrf.mxu1 }
  0x9f   :  { %v233_v27 = vadd.f32 %v232_v26, %v2044_v18 }
  0xa0   :  { %v293_v29 = vmul.f32 0.5, %v204_v25 }
  0xa1   :  { %v294_v30 = vmul.f32 0.5, %v233_v27 }
  0xa2   :  { %1676 = vtanh.f32 %v293_v29 }
  0xa3   :  { %1678 = vtanh.f32 %v294_v30 }
  0xa5   :  { %v261_v36 = vpop.f32.mrf.mxu2  ;;  %v205_v57 = vpop.f32.mrf.mxu0 }
  0xa6   :  { %v262_v38 = vadd.f32 %v261_v36, %v2058_v31  ;;  %v206_v59 = vadd.f32 %v205_v57, %v2042_v17  ;;  %v234_v61 = vpop.f32.mrf.mxu1 }
  0xa7   :  { %v235_v0 = vadd.f32 %v234_v61, %v2044_v18 }
  0xa8   :  { %v1677_v32 = vpop.eup %1676 }
  0xa9   :  { %v1679_v33 = vpop.eup %1678  ;;  %v297_v34 = vmul.f32 0.5, %v1677_v32 }
  0xaa   :  { %v298_v39 = vmul.f32 0.5, %v1679_v33 }
  0xab   :  { %v299_v37 = vadd.f32 0.5, %v297_v34 }
  0xac   :  { %v300_v47 = vadd.f32 0.5, %v298_v39 }
  0xad   :  { %v301_v42 = vmul.f32 %v2060_v35, %v299_v37  ;;  %v263_v6 = vpop.f32.mrf.mxu2  ;;  %v208_v29 = vpop.f32.mrf.mxu0 }
  0xae   :  { %v304_v49 = vsub.f32 1.0, %v300_v47  ;;  %v264_v11 = vadd.f32 %v263_v6, %v2058_v31  ;;  %v237_v30 = vpop.f32.mrf.mxu1  ;;  %v209_v47 = vadd.f32 %v208_v29, %v2042_v17 }
  0xaf   :  { %v302_v46 = vadd.f32 %v301_v42, %v262_v38 }
  0xb1   :  { %1680 = vtanh.f32 %v302_v46  ;;  %v238_v46 = vadd.f32 %v237_v30, %v2044_v18 }
  0xb5   :  { %v210_v32 = vpop.f32.mrf.mxu0 }
  0xb6   :  { %v239_v33 = vpop.f32.mrf.mxu1 }
  0xb7   :  { %v1681_v50 = vpop.eup %1680 }
  0xb8   :  { %v2073_v51 = vmul.f32 %v1681_v50, %v304_v49 }
  0xba   :  { %v307_v52 = vpack.c.bf16 %v2073_v51, %v2073_v51 }
  0xbc   :  { %1527 = vmatmul.msk.bf16.vlgmr.msra.gmra.mxu3 %vm340_vm1, %v307_v52 }
  0xbd   :  { %376 = vmatpush.bf16.msra.mxu3 %v2064_v43  ;;  %v2123_v34 = vpop.f32.mrf.mxu0 }
  0xbe   :  { %v2125_v36 = vpop.f32.mrf.mxu1 }
  0xc1   :  { %377 = vmatpush.bf16.msra.mxu3 %v2068_v48 }
  0xc5   :  { %v2127_v37 = vpop.f32.mrf.mxu0 }
  0xc6   :  { %v2129_v38 = vpop.f32.mrf.mxu1 }
  0xcc   :  { %1528 = vmatmul.msk.bf16.vlgmr.msrb.gmra.mxu3 %vm340_vm1, %v307_v52 }
  0xcd   :  { %412 = vmatpush.bf16.msrb.mxu3 %v2034_v13  ;;  %v2131_v39 = vpop.f32.mrf.mxu0 }
  0xce   :  { %v2133_v40 = vpop.f32.mrf.mxu1 }
  0xd1   :  { %413 = vmatpush.bf16.msrb.mxu3 %v2037_v15 }
  0xd5   :  { %v2135_v41 = vpop.f32.mrf.mxu0 }
  0xd6   :  { %v2137_v42 = vpop.f32.mrf.mxu1 }
  0xdc   :  { %1529 = vmatmul.msk.bf16.vlgmr.msra.gmra.mxu3 %vm340_vm1, %v307_v52 }
  0xdd   :  { %487 = vmatpush.bf16.msra.mxu3 %v2046_v23 }
  0xe1   :  { %488 = vmatpush.bf16.msra.mxu3 %v2051_v28 }
 0x13f   :  { %v353_v55 = vpop.f32.mrf.mxu3 }
 0x140   :  { %v383_v60 = vadd.f32 %v353_v55, %v206_v59 }
 0x142   :  { %v385_v62 = vmul.f32 0.5, %v383_v60  ;;  %v266_v60 = vpop.f32.mrf.mxu2 }
 0x144   :  { %1682 = vtanh.f32 %v385_v62 }
 0x147   :  { %v355_v58 = vpop.f32.mrf.mxu3 }
 0x14a   :  { %v1683_v4 = vpop.eup %1682 }
 0x14b   :  { %v389_v5 = vmul.f32 0.5, %v1683_v4 }
 0x14d   :  { %v391_v9 = vadd.f32 0.5, %v389_v5 }
 0x14f   :  { %v366_v63 = vpop.f32.mrf.mxu3 }
 0x150   :  { %v384_v1 = vadd.f32 %v366_v63, %v235_v0  ;;  %v267_v0 = vadd.f32 %v266_v60, %v2058_v31 }
 0x152   :  { %v386_v2 = vmul.f32 0.5, %v384_v1 }
 0x154   :  { %1684 = vtanh.f32 %v386_v2 }
 0x157   :  { %v368_v3 = vpop.f32.mrf.mxu3 }
 0x15a   :  { %v1685_v8 = vpop.eup %1684 }
 0x15b   :  { %v390_v14 = vmul.f32 0.5, %v1685_v8 }
 0x15d   :  { %v392_v19 = vadd.f32 0.5, %v390_v14 }
 0x15f   :  { %v379_v7 = vpop.f32.mrf.mxu3  ;;  %v397_v21 = vsub.f32 1.0, %v392_v19  ;;  %v399_v24 = vmul.f32 %v392_v19, %v2073_v51 }
 0x160   :  { %v393_v10 = vadd.f32 %v2060_v35, %v379_v7 }
 0x162   :  { %v394_v12 = vmul.f32 %v393_v10, %v391_v9 }
 0x164   :  { %v395_v16 = vadd.f32 %v394_v12, %v264_v11  ;;  %v268_v11 = vpop.f32.mrf.mxu2 }
 0x166   :  { %1686 = vtanh.f32 %v395_v16 }
 0x167   :  { %v381_v20 = vpop.f32.mrf.mxu3 }
 0x16c   :  { %v1687_v22 = vpop.eup %1686  ;;  %v271_v12 = vpop.f32.mrf.mxu2 }
 0x16d   :  { %v398_v25 = vmul.f32 %v1687_v22, %v397_v21  ;;  %v211_v21 = vadd.f32 %v210_v32, %v2042_v17  ;;  %v240_v22 = vadd.f32 %v239_v33, %v2044_v18  ;;  %v269_v32 = vadd.f32 %v268_v11, %v2058_v31 }
 0x16f   :  { %v2110_v26 = vadd.f32 %v399_v24, %v398_v25 }
 0x171   :  { %v402_v27 = vpack.c.bf16 %v2110_v26, %v2110_v26 }
 0x173   :  { %1530 = vmatmul.msk.bf16.vlgmr.msrb.gmra.mxu3 %vm340_vm1, %v402_v27  ;;  %1531 = vmatmul.msk.bf16.vlgmr.msrb.gmra.mxu0 %vm340_vm1, %v402_v27 }
 0x174   :  { %1532 = vmatmul.msk.bf16.vlgmr.msrb.gmra.mxu1 %vm340_vm1, %v402_v27  ;;  %562 = vmatpush.bf16.msrb.mxu3 %v2064_v43  ;;  %v2157_v14 = vpop.f32.mrf.mxu2 }
 0x175   :  { %598 = vmatpush.bf16.msrb.mxu0 %v2034_v13  ;;  %611 = vmatpush.bf16.msrb.mxu1 %v2046_v23 }
 0x178   :  { %563 = vmatpush.bf16.msrb.mxu3 %v2068_v48 }
 0x179   :  { %599 = vmatpush.bf16.msrb.mxu0 %v2037_v15  ;;  %612 = vmatpush.bf16.msrb.mxu1 %v2051_v28 }
 0x17c   :  { %v2159_v16 = vpop.f32.mrf.mxu2 }
 0x184   :  { %v2161_v19 = vpop.f32.mrf.mxu2 }
 0x1f0   :  { %v428_v44 = vpop.f32.mrf.mxu0 }
 0x1f1   :  { %v441_v45 = vpop.f32.mrf.mxu1  ;;  %v446_v49 = vadd.f32 %v428_v44, %v238_v46 }
 0x1f2   :  { %v455_v62 = vadd.f32 %v2060_v35, %v441_v45 }
 0x1f3   :  { %v448_v56 = vmul.f32 0.5, %v446_v49 }
 0x1f6   :  { %v415_v50 = vpop.f32.mrf.mxu3 }
 0x1f7   :  { %v445_v52 = vadd.f32 %v415_v50, %v209_v47 }
 0x1f8   :  { %v430_v53 = vpop.f32.mrf.mxu0 }
 0x1f9   :  { %v447_v54 = vmul.f32 0.5, %v445_v52  ;;  %v443_v55 = vpop.f32.mrf.mxu1 }
 0x1fb   :  { %1688 = vtanh.f32 %v447_v54 }
 0x1fc   :  { %1690 = vtanh.f32 %v448_v56 }
 0x1fe   :  { %v417_v57 = vpop.f32.mrf.mxu3 }
 0x201   :  { %v1689_v58 = vpop.eup %1688 }
 0x202   :  { %v451_v59 = vmul.f32 0.5, %v1689_v58  ;;  %v1691_v61 = vpop.eup %1690 }
 0x203   :  { %v452_v2 = vmul.f32 0.5, %v1691_v61 }
 0x204   :  { %v453_v63 = vadd.f32 0.5, %v451_v59 }
 0x205   :  { %v454_v4 = vadd.f32 0.5, %v452_v2 }
 0x206   :  { %v456_v1 = vmul.f32 %v455_v62, %v453_v63 }
 0x207   :  { %v459_v5 = vsub.f32 1.0, %v454_v4  ;;  %v461_v7 = vmul.f32 %v454_v4, %v2110_v26  ;;  %v243_v4 = vadd.f32 %v2125_v36, %v2044_v18 }
 0x208   :  { %v457_v3 = vadd.f32 %v456_v1, %v267_v0  ;;  %v214_v0 = vadd.f32 %v2123_v34, %v2042_v17 }
 0x20a   :  { %1692 = vtanh.f32 %v457_v3 }
 0x210   :  { %v1693_v6 = vpop.eup %1692 }
 0x211   :  { %v460_v8 = vmul.f32 %v1693_v6, %v459_v5 }
 0x213   :  { %v2144_v9 = vadd.f32 %v461_v7, %v460_v8 }
 0x215   :  { %v464_v10 = vpack.c.bf16 %v2144_v9, %v2144_v9 }
 0x217   :  { %1533 = vmatmul.msk.bf16.vlgmr.msrb.gmra.mxu2 %vm340_vm1, %v464_v10  ;;  %1534 = vmatmul.msk.bf16.vlgmr.msra.gmra.mxu3 %vm340_vm1, %v464_v10 }
 0x218   :  { %1535 = vmatmul.msk.bf16.vlgmr.msra.gmra.mxu0 %vm340_vm1, %v464_v10  ;;  %624 = vmatpush.bf16.msrb.mxu2 %v2064_v43 }
 0x219   :  { %660 = vmatpush.bf16.msra.mxu3 %v2034_v13  ;;  %673 = vmatpush.bf16.msra.mxu0 %v2046_v23 }
 0x21c   :  { %625 = vmatpush.bf16.msrb.mxu2 %v2068_v48 }
 0x21d   :  { %661 = vmatpush.bf16.msra.mxu3 %v2037_v15  ;;  %674 = vmatpush.bf16.msra.mxu0 %v2051_v28 }
 0x295   :  { %v503_v20 = vpop.f32.mrf.mxu0 }
 0x296   :  { %v517_v53 = vadd.f32 %v2060_v35, %v503_v20  ;;  %v272_v20 = vadd.f32 %v271_v12, %v2058_v31  ;;  %v216_v12 = vadd.f32 %v2127_v37, %v2042_v17 }
 0x29a   :  { %v477_v24 = vpop.f32.mrf.mxu2  ;;  %v490_v25 = vpop.f32.mrf.mxu3 }
 0x29b   :  { %v507_v27 = vadd.f32 %v477_v24, %v211_v21  ;;  %v508_v29 = vadd.f32 %v490_v25, %v240_v22 }
 0x29d   :  { %v509_v30 = vmul.f32 0.5, %v507_v27  ;;  %v505_v44 = vpop.f32.mrf.mxu0  ;;  %v510_v45 = vmul.f32 0.5, %v508_v29 }
 0x29f   :  { %1694 = vtanh.f32 %v509_v30 }
 0x2a0   :  { %1696 = vtanh.f32 %v510_v45 }
 0x2a2   :  { %v479_v46 = vpop.f32.mrf.mxu2  ;;  %v492_v47 = vpop.f32.mrf.mxu3 }
 0x2a3   :  { %v245_v47 = vadd.f32 %v2129_v38, %v2044_v18 }
 0x2a5   :  { %v1695_v49 = vpop.eup %1694 }
 0x2a6   :  { %v513_v50 = vmul.f32 0.5, %v1695_v49  ;;  %v1697_v52 = vpop.eup %1696 }
 0x2a7   :  { %v514_v55 = vmul.f32 0.5, %v1697_v52 }
 0x2a8   :  { %v515_v54 = vadd.f32 0.5, %v513_v50 }
 0x2a9   :  { %v516_v57 = vadd.f32 0.5, %v514_v55 }
 0x2aa   :  { %v518_v33 = vmul.f32 %v517_v53, %v515_v54  ;;  %v1562_v54 = vld [vmem:[#allocation8 + $0x18] sm:$0xf] }
 0x2ab   :  { %v521_v58 = vsub.f32 1.0, %v516_v57  ;;  %v523_v61 = vmul.f32 %v516_v57, %v2144_v9  ;;  %v1652_v57 = vld [vmem:[#allocation8 + $0x8] sm:$0xf0] }
 0x2ac   :  { %v519_v56 = vadd.f32 %v518_v33, %v269_v32  ;;  %v1655_v32 = vld [vmem:[#allocation8 + $0x20] sm:$0xf0]  ;;  %v1550_v33 = vld [vmem:[#allocation8] sm:$0xf] }
 0x2ae   :  { %1698 = vtanh.f32 %v519_v56  ;;  %v1563_v56 = vor.u32 %v1655_v32, %v1562_v54 }
 0x2b4   :  { %v1699_v59 = vpop.eup %1698 }
 0x2b5   :  { %v522_v60 = vmul.f32 %v1699_v59, %v521_v58 }
 0x2b7   :  { %v2168_v62 = vadd.f32 %v523_v61, %v522_v60 }
 0x2b9   :  { %v526_v63 = vpack.c.bf16 %v2168_v62, %v2168_v62 }
 0x2bb   :  { %1536 = vmatmul.msk.bf16.vlgmr.msra.gmra.mxu1 %vm340_vm1, %v526_v63  ;;  %1537 = vmatmul.msk.bf16.vlgmr.msra.gmra.mxu2 %vm340_vm1, %v526_v63 }
 0x2bc   :  { %1538 = vmatmul.msk.bf16.vlgmr.msrb.gmra.mxu3 %vm340_vm1, %v526_v63  ;;  %686 = vmatpush.bf16.msra.mxu1 %v2064_v43 }
 0x2bd   :  { %722 = vmatpush.bf16.msra.mxu2 %v2034_v13  ;;  %735 = vmatpush.bf16.msrb.mxu3 %v2046_v23 }
 0x2c0   :  { %687 = vmatpush.bf16.msra.mxu1 %v2068_v48 }
 0x2c1   :  { %723 = vmatpush.bf16.msra.mxu2 %v2037_v15  ;;  %736 = vmatpush.bf16.msrb.mxu3 %v2051_v28 }
 0x338   :  { %v539_v1 = vpop.f32.mrf.mxu1 }
 0x339   :  { %v569_v2 = vadd.f32 %v539_v1, %v214_v0 }
 0x33b   :  { %v571_v3 = vmul.f32 0.5, %v569_v2  ;;  %v274_v2 = vadd.f32 %v2157_v14, %v2058_v31  ;;  %v782_v14 = vpack.c.bf16 %v2110_v26, %v2073_v51 }
 0x33d   :  { %1700 = vtanh.f32 %v571_v3 }
 0x33e   :  { %v552_v5 = vpop.f32.mrf.mxu2 }
 0x33f   :  { %v570_v13 = vadd.f32 %v552_v5, %v243_v4  ;;  %v565_v6 = vpop.f32.mrf.mxu3 }
 0x340   :  { %v541_v23 = vpop.f32.mrf.mxu1  ;;  %v579_v28 = vadd.f32 %v2060_v35, %v565_v6 }
 0x341   :  { %v572_v7 = vmul.f32 0.5, %v570_v13 }
 0x343   :  { %v1701_v8 = vpop.eup %1700  ;;  %1702 = vtanh.f32 %v572_v7 }
 0x344   :  { %v575_v15 = vmul.f32 0.5, %v1701_v8 }
 0x346   :  { %v577_v10 = vadd.f32 0.5, %v575_v15  ;;  %v554_v11 = vpop.f32.mrf.mxu2 }
 0x347   :  { %v567_v34 = vpop.f32.mrf.mxu3 }
 0x348   :  { %v580_v21 = vmul.f32 %v579_v28, %v577_v10  ;;  %v783_v28 = vpack.c.bf16 %v2168_v62, %v2144_v9 }
 0x349   :  { %v1703_v22 = vpop.eup %1702 }
 0x34a   :  { %v576_v24 = vmul.f32 0.5, %v1703_v22  ;;  %v581_v36 = vadd.f32 %v580_v21, %v272_v20  ;;  %v248_v21 = vadd.f32 %v2133_v40, %v2044_v18  ;;  %v219_v22 = vadd.f32 %v2131_v39, %v2042_v17  ;;  %v1552_v40 = vld [vmem:[#allocation8 + $0xc] sm:$0xf0] }
 0x34c   :  { %1704 = vtanh.f32 %v581_v36  ;;  %v578_v25 = vadd.f32 0.5, %v576_v24 }
 0x34e   :  { %v583_v27 = vsub.f32 1.0, %v578_v25  ;;  %v585_v30 = vmul.f32 %v578_v25, %v2168_v62  ;;  %v1654_v25 = vld [vmem:[#allocation8 + $0x1c] sm:$0xf] }
 0x352   :  { %v1705_v29 = vpop.eup %1704 }
 0x353   :  { %v584_v44 = vmul.f32 %v1705_v29, %v583_v27  ;;  %v1564_v27 = vld [vmem:[#allocation8 + $0x24] sm:$0xf0] }
 0x355   :  { %v586_v45 = vadd.f32 %v585_v30, %v584_v44  ;;  %v1567_v30 = vor.u32 %v1654_v25, %v1564_v27  ;;  %v1570_v44 = vld [vmem:[#allocation8 + $0x20] sm:$0xf] }
 0x357   :  { %v588_v46 = vpack.c.bf16 %v586_v45, %v586_v45 }
 0x359   :  { %1539 = vmatmul.msk.bf16.vlgmr.msrb.gmra.mxu0 %vm340_vm1, %v588_v46  ;;  %1540 = vmatmul.msk.bf16.vlgmr.msrb.gmra.mxu1 %vm340_vm1, %v588_v46 }
 0x35a   :  { %1541 = vmatmul.msk.bf16.vlgmr.msrb.gmra.mxu2 %vm340_vm1, %v588_v46  ;;  %748 = vmatpush.bf16.msrb.mxu0 %v2064_v43  ;;  %v1551_v43 = vor.u32 %v1652_v57, %v1550_v33  ;;  %v1651_v46 = vld [vmem:[#allocation8 + $0x4] sm:$0xf] }
 0x35b   :  { %852 = vmatpush.bf16.msrb.mxu1 %v1563_v56  ;;  %881 = vmatpush.bf16.msrb.mxu2 %v1567_v30  ;;  %v277_v56 = vadd.f32 %v2159_v16, %v2058_v31  ;;  %v794_v16 = vld [vmem:[#allocation10] sm:$0x7] }
 0x35e   :  { %749 = vmatpush.bf16.msrb.mxu0 %v2068_v48 }
 0x35f   :  { %853 = vmatpush.bf16.msrb.mxu1 %v1551_v43 }
 0x3d6   :  { %v601_v49 = vpop.f32.mrf.mxu0  ;;  %v614_v50 = vpop.f32.mrf.mxu1 }
 0x3d7   :  { %v631_v52 = vadd.f32 %v601_v49, %v216_v12  ;;  %v632_v53 = vadd.f32 %v614_v50, %v245_v47  ;;  %v1555_v47 = vor.u32 %v1651_v46, %v1552_v40  ;;  %v2282_v46 = vperm.slane %v794_v16, 2 }
 0x3d9   :  { %v633_v55 = vmul.f32 0.5, %v631_v52  ;;  %v634_v58 = vmul.f32 0.5, %v632_v53  ;;  %882 = vmatpush.bf16.msrb.mxu2 %v1555_v47  ;;  %v1558_v52 = vld [vmem:[#allocation8 + $0x8] sm:$0xf]  ;;  %v1653_v53 = vld [vmem:[#allocation8 + $0x10] sm:$0xf0] }
 0x3da   :  { %v1559_v54 = vor.u32 %v1653_v53, %v1558_v52  ;;  %v2287_v53 = vld [vmem:[#allocation11] ss:$0 sm:$0xff] }
 0x3db   :  { %1706 = vtanh.f32 %v633_v55 }
 0x3dc   :  { %1708 = vtanh.f32 %v634_v58 }
 0x3dd   :  { %v627_v48 = vpop.f32.mrf.mxu2 }
 0x3de   :  { %v603_v37 = vpop.f32.mrf.mxu0  ;;  %v616_v59 = vpop.f32.mrf.mxu1  ;;  %v641_v0 = vadd.f32 %v2060_v35, %v627_v48 }
 0x3e1   :  { %v1707_v38 = vpop.eup %1706 }
 0x3e2   :  { %v637_v60 = vmul.f32 0.5, %v1707_v38  ;;  %v1709_v61 = vpop.eup %1708 }
 0x3e3   :  { %v638_v4 = vmul.f32 0.5, %v1709_v61 }
 0x3e4   :  { %v639_v63 = vadd.f32 0.5, %v637_v60 }
 0x3e5   :  { %v629_v1 = vpop.f32.mrf.mxu2  ;;  %v640_v13 = vadd.f32 0.5, %v638_v4  ;;  %v1598_v4 = vld [vmem:[%s2448_s6 + $0x18] sm:$0xf] }
 0x3e6   :  { %v642_v3 = vmul.f32 %v641_v0, %v639_v63  ;;  %v2230_v0 = vperm.slane %v794_v16, 0 }
 0x3e7   :  { %v645_v6 = vsub.f32 1.0, %v640_v13  ;;  %v647_v7 = vmul.f32 %v640_v13, %v586_v45 }
 0x3e8   :  { %v643_v5 = vadd.f32 %v642_v3, %v274_v2 }
 0x3ea   :  { %1710 = vtanh.f32 %v643_v5  ;;  %v1661_v5 = vld [vmem:[%s2448_s6 + $0x20] sm:$0xf0] }
 0x3eb   :  { %v2239_v13 = vor.u32 %v1661_v5, %v1598_v4 }
 0x3f0   :  { %v1711_v23 = vpop.eup %1710 }
 0x3f1   :  { %v646_v8 = vmul.f32 %v1711_v23, %v645_v6  ;;  %v221_v6 = vadd.f32 %v2135_v41, %v2042_v17  ;;  %v250_v23 = vadd.f32 %v2137_v42, %v2044_v18  ;;  %v1658_v17 = vld [vmem:[%s2448_s6 + $0x8] sm:$0xf0] }
 0x3f3   :  { %v648_v15 = vadd.f32 %v647_v7, %v646_v8 }
 0x3f5   :  { %v650_v10 = vpack.c.bf16 %v648_v15, %v648_v15  ;;  %v784_v11 = vpack.c.bf16 %v648_v15, %v586_v45  ;;  %v1656_v45 = vld [vmem:[#allocation8 + $0x28] sm:$0xf0] }
 0x3f6   :  { %v1571_v12 = vor.u32 %v1656_v45, %v1570_v44 }
 0x3f7   :  { %1542 = vmatmul.msk.bf16.vlgmr.msra.gmra.mxu3 %vm340_vm1, %v650_v10  ;;  %1543 = vmatmul.msk.bf16.vlgmr.msra.gmra.mxu0 %vm340_vm1, %v650_v10 }
 0x3f8   :  { %1544 = vmatmul.msk.bf16.vlgmr.msra.gmra.mxu1 %vm340_vm1, %v650_v10  ;;  %910 = vmatpush.bf16.msra.mxu3 %v1571_v12  ;;  %v279_v12 = vadd.f32 %v2161_v19, %v2058_v31  ;;  %v1606_v31 = vld [vmem:[%s2448_s6 + $0x20] sm:$0xf]  ;;  %v1662_v19 = vld [vmem:[%s2448_s6 + $0x28] sm:$0xf0] }
 0x3f9   :  { %1000 = vmatpush.bf16.msra.mxu0 %v2239_v13 }
 0x3fc   :  { %911 = vmatpush.bf16.msra.mxu3 %v1559_v54 }
 0x408   :  { %1572 = vmatmul.msk.bf16.vlgmr.msrb.gmra.mxu1 %vm340_vm1, %v782_v14 }
 0x418   :  { %1573 = vmatmul.msk.bf16.gmra.mxu1 %vm340_vm1, %v783_v28 }
 0x428   :  { %1574 = vmatmul.msk.bf16.gmra.mxu1 %vm340_vm1, %v784_v11 }
 0x474   :  { %v676_v34 = vpop.f32.mrf.mxu0 }
 0x475   :  { %v689_v20 = vpop.f32.mrf.mxu1  ;;  %v694_v24 = vadd.f32 %v676_v34, %v248_v21  ;;  %v1660_v34 = vld [vmem:[%s2448_s6 + $0x1c] sm:$0xf] }
 0x476   :  { %v703_v33 = vadd.f32 %v2060_v35, %v689_v20  ;;  %v1600_v20 = vld [vmem:[%s2448_s6 + $0x24] sm:$0xf0] }
 0x477   :  { %v696_v9 = vmul.f32 0.5, %v694_v24  ;;  %v2263_v21 = vor.u32 %v1660_v34, %v1600_v20 }
 0x479   :  { %1074 = vmatpush.bf16.msra.mxu1 %v2263_v21 }
 0x47a   :  { %v663_v51 = vpop.f32.mrf.mxu3 }
 0x47b   :  { %v693_v26 = vadd.f32 %v663_v51, %v219_v22  ;;  %v1657_v51 = vld [vmem:[%s2448_s6 + $0x4] sm:$0xf] }
 0x47c   :  { %v678_v36 = vpop.f32.mrf.mxu0 }
 0x47d   :  { %v695_v62 = vmul.f32 0.5, %v693_v26  ;;  %v691_v29 = vpop.f32.mrf.mxu1  ;;  %v1588_v26 = vld [vmem:[%s2448_s6 + $0xc] sm:$0xf0] }
 0x47e   :  { %v2273_v25 = vor.u32 %v1657_v51, %v1588_v26  ;;  %v2276_v29 = vperm.slane %v794_v16, 1 }
 0x47f   :  { %1712 = vtanh.f32 %v695_v62 }
 0x480   :  { %1714 = vtanh.f32 %v696_v9  ;;  %1075 = vmatpush.bf16.msra.mxu1 %v2273_v25 }
 0x482   :  { %v665_v39 = vpop.f32.mrf.mxu3 }
 0x485   :  { %v1713_v49 = vpop.eup %1712  ;;  %v855_v1 = vpop.f32.mrf.mxu1 }
 0x486   :  { %v699_v50 = vmul.f32 0.5, %v1713_v49  ;;  %v1715_v32 = vpop.eup %1714  ;;  %v856_v3 = vadd.f32 %v855_v1, %v2230_v0 }
 0x487   :  { %v700_v58 = vmul.f32 0.5, %v1715_v32 }
 0x488   :  { %v701_v55 = vadd.f32 0.5, %v699_v50  ;;  %v945_v7 = vmul.f32 0.5, %v856_v3 }
 0x489   :  { %v702_v48 = vadd.f32 0.5, %v700_v58 }
 0x48a   :  { %v704_v57 = vmul.f32 %v703_v33, %v701_v55 }
 0x48b   :  { %v707_v37 = vsub.f32 1.0, %v702_v48  ;;  %v709_v38 = vmul.f32 %v702_v48, %v648_v15  ;;  %v1659_v48 = vld [vmem:[%s2448_s6 + $0x10] sm:$0xf0] }
 0x48c   :  { %v705_v43 = vadd.f32 %v704_v57, %v277_v56  ;;  %v2297_v57 = vor.u32 %v1662_v19, %v1606_v31 }
 0x48e   :  { %1716 = vtanh.f32 %v705_v43  ;;  %v1594_v43 = vld [vmem:[%s2448_s6 + $0x8] sm:$0xf]  ;;  %1148 = vmatpush.bf16.msrb.mxu1 %v2297_v57 }
 0x48f   :  { %1718 = vtanh.f32 %v945_v7  ;;  %v857_v7 = vpop.f32.mrf.mxu1 }
 0x494   :  { %v1717_v59 = vpop.eup %1716 }
 0x495   :  { %v708_v60 = vmul.f32 %v1717_v59, %v707_v37  ;;  %v1719_v36 = vpop.eup %1718 }
 0x496   :  { %v949_v62 = vmul.f32 0.5, %v1719_v36 }
 0x497   :  { %v2217_v61 = vadd.f32 %v709_v38, %v708_v60 }
 0x498   :  { %v951_v49 = vadd.f32 0.5, %v949_v62 }
 0x499   :  { %v712_v63 = vpack.c.bf16 %v2217_v61, %v2217_v61 }
 0x49a   :  { %v953_v55 = vmul.f32 %v2287_v53, %v951_v49 }
 0x49b   :  { %1545 = vmatmul.msk.bf16.vlgmr.msra.gmra.mxu2 %vm340_vm1, %v712_v63  ;;  %1546 = vmatmul.msk.bf16.vlgmr.msrb.gmra.mxu3 %vm340_vm1, %v712_v63 }
 0x49c   :  { %1547 = vmatmul.msk.bf16.vlgmr.msrb.gmra.mxu0 %vm340_vm1, %v712_v63  ;;  %1122 = vmatpush.bf16.msrb.mxu3 %v2239_v13  ;;  %v2308_v63 = vor.u32 %v1659_v48, %v1594_v43 }
 0x49d   :  { %1087 = vmatpush.bf16.msra.mxu2 %v2297_v57 }
 0x49e   :  { %1149 = vmatpush.bf16.msrb.mxu1 %v2308_v63 }
 0x4a1   :  { %1088 = vmatpush.bf16.msra.mxu2 %v2308_v63 }
 0x4ab   :  { %1576 = vmatmul.msk.bf16.vlgmr.msrb.gmra.mxu2 %vm340_vm1, %v782_v14  ;;  %1580 = vmatmul.msk.bf16.vlgmr.msra.gmra.mxu3 %vm340_vm1, %v782_v14 }
 0x4ac   :  { %1183 = vmatpush.bf16.msrb.mxu2 %v2239_v13 }
 0x4bb   :  { %1577 = vmatmul.msk.bf16.gmra.mxu2 %vm340_vm1, %v783_v28  ;;  %1581 = vmatmul.msk.bf16.gmra.mxu3 %vm340_vm1, %v783_v28  ;;  %v1586_v28 = vld [vmem:[%s2448_s6] sm:$0xf] }
 0x4bc   :  { %v2253_v41 = vor.u32 %v1658_v17, %v1586_v28 }
 0x4be   :  { %1001 = vmatpush.bf16.msra.mxu0 %v2253_v41  ;;  %1123 = vmatpush.bf16.msrb.mxu3 %v2253_v41 }
 0x4bf   :  { %1184 = vmatpush.bf16.msrb.mxu2 %v2253_v41 }
 0x4c2   :  { %1013 = vmatpush.bf16.msrb.mxu0 %v2263_v21  ;;  %1196 = vmatpush.bf16.msra.mxu3 %v2263_v21 }
 0x4c6   :  { %1014 = vmatpush.bf16.msrb.mxu0 %v2273_v25  ;;  %1197 = vmatpush.bf16.msra.mxu3 %v2273_v25 }
 0x4cb   :  { %1578 = vmatmul.msk.bf16.gmra.mxu2 %vm340_vm1, %v784_v11  ;;  %1582 = vmatmul.msk.bf16.gmra.mxu3 %vm340_vm1, %v784_v11 }
 0x519   :  { %v751_v2 = vpop.f32.mrf.mxu0 }
 0x51a   :  { %v765_v44 = vadd.f32 %v2060_v35, %v751_v2 }
 0x51e   :  { %v725_v8 = vpop.f32.mrf.mxu2  ;;  %v738_v15 = vpop.f32.mrf.mxu3 }
 0x51f   :  { %v755_v10 = vadd.f32 %v725_v8, %v221_v6  ;;  %v756_v14 = vadd.f32 %v738_v15, %v250_v23  ;;  %v858_v15 = vadd.f32 %v857_v7, %v2230_v0 }
 0x521   :  { %v757_v18 = vmul.f32 0.5, %v755_v10  ;;  %v753_v42 = vpop.f32.mrf.mxu0  ;;  %v758_v11 = vmul.f32 0.5, %v756_v14 }
 0x523   :  { %1720 = vtanh.f32 %v757_v18 }
 0x524   :  { %1722 = vtanh.f32 %v758_v11 }
 0x526   :  { %v727_v22 = vpop.f32.mrf.mxu2  ;;  %v740_v24 = vpop.f32.mrf.mxu3 }
 0x529   :  { %v1721_v27 = vpop.eup %1720 }
 0x52a   :  { %v761_v9 = vmul.f32 0.5, %v1721_v27  ;;  %v1723_v30 = vpop.eup %1722 }
 0x52b   :  { %v762_v50 = vmul.f32 0.5, %v1723_v30 }
 0x52c   :  { %v763_v45 = vadd.f32 0.5, %v761_v9 }
 0x52d   :  { %v764_v33 = vadd.f32 0.5, %v762_v50 }
 0x52e   :  { %v766_v40 = vmul.f32 %v765_v44, %v763_v45  ;;  %v884_v47 = vpop.f32.mrf.mxu2  ;;  %v913_v39 = vpop.f32.mrf.mxu3 }
 0x52f   :  { %v885_v52 = vadd.f32 %v884_v47, %v2276_v29  ;;  %v914_v35 = vadd.f32 %v913_v39, %v2282_v46  ;;  %v769_v58 = vsub.f32 1.0, %v764_v33  ;;  %v771_v60 = vmul.f32 %v764_v33, %v2217_v61 }
 0x530   :  { %v767_v54 = vadd.f32 %v766_v40, %v279_v12 }
 0x531   :  { %v946_v32 = vmul.f32 0.5, %v885_v52  ;;  %v954_v56 = vadd.f32 %v953_v55, %v914_v35 }
 0x532   :  { %1724 = vtanh.f32 %v767_v54  ;;  %v860_v54 = vpop.f32.mrf.mxu1 }
 0x533   :  { %1726 = vtanh.f32 %v946_v32 }
 0x534   :  { %1728 = vtanh.f32 %v954_v56 }
 0x536   :  { %v886_v14 = vpop.f32.mrf.mxu2  ;;  %v915_v24 = vpop.f32.mrf.mxu3 }
 0x537   :  { %v887_v18 = vadd.f32 %v886_v14, %v2276_v29  ;;  %v916_v9 = vadd.f32 %v915_v24, %v2282_v46 }
 0x538   :  { %v1725_v37 = vpop.eup %1724 }
 0x539   :  { %v1727_v59 = vpop.eup %1726  ;;  %v770_v38 = vmul.f32 %v1725_v37, %v769_v58  ;;  %v861_v37 = vadd.f32 %v860_v54, %v2230_v0 }
 0x53a   :  { %v950_v16 = vmul.f32 0.5, %v1727_v59  ;;  %v1729_v5 = vpop.eup %1728  ;;  %v862_v35 = vpop.f32.mrf.mxu1 }
 0x53b   :  { %v772_v1 = vadd.f32 %v771_v60, %v770_v38 }
 0x53c   :  { %v952_v2 = vadd.f32 0.5, %v950_v16 }
 0x53d   :  { %v785_v3 = vpack.c.bf16 %v772_v1, %v2217_v61 }
 0x53e   :  { %v956_v4 = vsub.f32 1.0, %v952_v2  ;;  %v889_v32 = vpop.f32.mrf.mxu2 }
 0x53f   :  { %1575 = vmatmul.msk.bf16.gmra.mxu1 %vm340_vm1, %v785_v3  ;;  %1579 = vmatmul.msk.bf16.gmra.mxu2 %vm340_vm1, %v785_v3  ;;  %v890_v59 = vadd.f32 %v889_v32, %v2276_v29 }
 0x540   :  { %v957_v6 = vmul.f32 %v1729_v5, %v956_v4  ;;  %1583 = vmatmul.msk.bf16.gmra.mxu3 %vm340_vm1, %v785_v3 }
 0x542   :  { %v958_v23 = vpack.c.bf16 %v957_v6, %v957_v6  ;;  %v2340_v55 = vpop.f32.mrf.mxu1 }
 0x544   :  { %1608 = vmatmul.msk.bf16.vlgmr.msra.gmra.mxu0 %vm340_vm1, %v958_v23 }
 0x545   :  { %1026 = vmatpush.bf16.msra.mxu0 %v2297_v57 }
 0x546   :  { %v891_v33 = vpop.f32.mrf.mxu2 }
 0x549   :  { %1027 = vmatpush.bf16.msra.mxu0 %v2308_v63 }
 0x54a   :  { %v2344_v19 = vpop.f32.mrf.mxu1 }
 0x54e   :  { %v2342_v31 = vpop.f32.mrf.mxu2 }
 0x554   :  { %1609 = vmatmul.msk.bf16.vlgmr.msrb.gmra.mxu0 %vm340_vm1, %v958_v23 }
 0x555   :  { %1061 = vmatpush.bf16.msrb.mxu0 %v2239_v13 }
 0x556   :  { %v2346_v56 = vpop.f32.mrf.mxu2 }
 0x559   :  { %1062 = vmatpush.bf16.msrb.mxu0 %v2253_v41 }
 0x564   :  { %1610 = vmatmul.msk.bf16.vlgmr.msra.gmra.mxu0 %vm340_vm1, %v958_v23 }
 0x565   :  { %1135 = vmatpush.bf16.msra.mxu0 %v2263_v21 }
 0x569   :  { %1136 = vmatpush.bf16.msra.mxu0 %v2273_v25 }
 0x5bc   :  { %v2348_v58 = vpop.f32.mrf.mxu1 }
 0x5c1   :  { %v1003_v61 = vpop.f32.mrf.mxu0 }
 0x5c2   :  { %v1033_v10 = vadd.f32 %v1003_v61, %v858_v15  ;;  %v2350_v43 = vpop.f32.mrf.mxu2 }
 0x5c4   :  { %v1035_v28 = vmul.f32 0.5, %v1033_v10  ;;  %v2352_v48 = vpop.f32.mrf.mxu1 }
 0x5c6   :  { %1730 = vtanh.f32 %v1035_v28 }
 0x5c9   :  { %v1005_v8 = vpop.f32.mrf.mxu0 }
 0x5ca   :  { %v2356_v38 = vpop.f32.mrf.mxu2  ;;  %v918_v8 = vpop.f32.mrf.mxu3 }
 0x5cc   :  { %v1731_v20 = vpop.eup %1730 }
 0x5cd   :  { %v1039_v22 = vmul.f32 0.5, %v1731_v20 }
 0x5cf   :  { %v1041_v36 = vadd.f32 0.5, %v1039_v22 }
 0x5d1   :  { %v1016_v17 = vpop.f32.mrf.mxu0 }
 0x5d2   :  { %v1034_v42 = vadd.f32 %v1016_v17, %v887_v18  ;;  %v919_v17 = vadd.f32 %v918_v8, %v2282_v46 }
 0x5d4   :  { %v1036_v11 = vmul.f32 0.5, %v1034_v42 }
 0x5d6   :  { %1732 = vtanh.f32 %v1036_v11 }
 0x5d9   :  { %v1018_v34 = vpop.f32.mrf.mxu0 }
 0x5dc   :  { %v1733_v26 = vpop.eup %1732 }
 0x5dd   :  { %v1040_v30 = vmul.f32 0.5, %v1733_v26 }
 0x5df   :  { %v1042_v45 = vadd.f32 0.5, %v1040_v30 }
 0x5e1   :  { %v1029_v51 = vpop.f32.mrf.mxu0  ;;  %v1047_v40 = vsub.f32 1.0, %v1042_v45  ;;  %v1049_v39 = vmul.f32 %v1042_v45, %v957_v6 }
 0x5e2   :  { %v1043_v27 = vadd.f32 %v2287_v53, %v1029_v51 }
 0x5e4   :  { %v1044_v62 = vmul.f32 %v1043_v27, %v1041_v36  ;;  %v920_v27 = vpop.f32.mrf.mxu3 }
 0x5e6   :  { %v1045_v44 = vadd.f32 %v1044_v62, %v916_v9 }
 0x5e8   :  { %1734 = vtanh.f32 %v1045_v44 }
 0x5e9   :  { %v1031_v12 = vpop.f32.mrf.mxu0 }
 0x5ec   :  { %v2369_v9 = vpop.f32.mrf.mxu3 }
 0x5ee   :  { %v1735_v47 = vpop.eup %1734 }
 0x5ef   :  { %v1048_v49 = vmul.f32 %v1735_v47, %v1047_v40  ;;  %v892_v40 = vadd.f32 %v891_v33, %v2276_v29  ;;  %v863_v47 = vadd.f32 %v862_v35, %v2230_v0  ;;  %v921_v33 = vadd.f32 %v920_v27, %v2282_v46 }
 0x5f1   :  { %v1050_v50 = vadd.f32 %v1049_v39, %v1048_v49 }
 0x5f3   :  { %v1051_v52 = vpack.c.bf16 %v1050_v50, %v1050_v50 }
 0x5f4   :  { %v2371_v62 = vpop.f32.mrf.mxu3 }
 0x5f5   :  { %1611 = vmatmul.msk.bf16.vlgmr.msrb.gmra.mxu0 %vm340_vm1, %v1051_v52  ;;  %1612 = vmatmul.msk.bf16.vlgmr.msra.gmra.mxu1 %vm340_vm1, %v1051_v52 }
 0x5f6   :  { %1613 = vmatmul.msk.bf16.vlgmr.msra.gmra.mxu2 %vm340_vm1, %v1051_v52  ;;  %1209 = vmatpush.bf16.msrb.mxu0 %v2297_v57 }
 0x5f7   :  { %1244 = vmatpush.bf16.msra.mxu1 %v2239_v13  ;;  %1257 = vmatpush.bf16.msra.mxu2 %v2263_v21 }
 0x5fa   :  { %1210 = vmatpush.bf16.msrb.mxu0 %v2308_v63 }
 0x5fb   :  { %1245 = vmatpush.bf16.msra.mxu1 %v2253_v41  ;;  %1258 = vmatpush.bf16.msra.mxu2 %v2273_v25 }
 0x5fc   :  { %v2373_v30 = vpop.f32.mrf.mxu3 }
 0x604   :  { %v2375_v44 = vpop.f32.mrf.mxu3 }
 0x672   :  { %v1064_v60 = vpop.f32.mrf.mxu0  ;;  %v1077_v16 = vpop.f32.mrf.mxu1 }
 0x673   :  { %v1094_v1 = vadd.f32 %v1064_v60, %v861_v37  ;;  %v1095_v2 = vadd.f32 %v1077_v16, %v890_v59 }
 0x675   :  { %v1096_v3 = vmul.f32 0.5, %v1094_v1  ;;  %v1097_v4 = vmul.f32 0.5, %v1095_v2 }
 0x677   :  { %1736 = vtanh.f32 %v1096_v3 }
 0x678   :  { %1738 = vtanh.f32 %v1097_v4 }
 0x679   :  { %v1090_v5 = vpop.f32.mrf.mxu2 }
 0x67a   :  { %v1066_v6 = vpop.f32.mrf.mxu0  ;;  %v1079_v23 = vpop.f32.mrf.mxu1  ;;  %v1104_v14 = vadd.f32 %v2287_v53, %v1090_v5 }
 0x67d   :  { %v1737_v61 = vpop.eup %1736 }
 0x67e   :  { %v1100_v7 = vmul.f32 0.5, %v1737_v61  ;;  %v1739_v15 = vpop.eup %1738 }
 0x67f   :  { %v1101_v42 = vmul.f32 0.5, %v1739_v15 }
 0x680   :  { %v1102_v10 = vadd.f32 0.5, %v1100_v7 }
 0x681   :  { %v1092_v28 = vpop.f32.mrf.mxu2  ;;  %v1103_v34 = vadd.f32 0.5, %v1101_v42 }
 0x682   :  { %v1105_v18 = vmul.f32 %v1104_v14, %v1102_v10  ;;  %v866_v28 = vadd.f32 %v2340_v55, %v2230_v0 }
 0x683   :  { %v1108_v20 = vsub.f32 1.0, %v1103_v34  ;;  %v1110_v24 = vmul.f32 %v1103_v34, %v1050_v50 }
 0x684   :  { %v1106_v11 = vadd.f32 %v1105_v18, %v919_v17  ;;  %v895_v17 = vadd.f32 %v2342_v31, %v2276_v29  ;;  %v924_v31 = vadd.f32 %v2369_v9, %v2282_v46  ;;  %v868_v9 = vadd.f32 %v2344_v19, %v2230_v0 }
 0x686   :  { %1740 = vtanh.f32 %v1106_v11 }
 0x68c   :  { %v1741_v22 = vpop.eup %1740 }
 0x68d   :  { %v1109_v51 = vmul.f32 %v1741_v22, %v1108_v20 }
 0x68f   :  { %v1111_v26 = vadd.f32 %v1110_v24, %v1109_v51 }
 0x691   :  { %v1112_v36 = vpack.c.bf16 %v1111_v26, %v1111_v26 }
 0x693   :  { %1614 = vmatmul.msk.bf16.vlgmr.msrb.gmra.mxu3 %vm340_vm1, %v1112_v36  ;;  %1615 = vmatmul.msk.bf16.vlgmr.msra.gmra.mxu0 %vm340_vm1, %v1112_v36 }
 0x694   :  { %1616 = vmatmul.msk.bf16.vlgmr.msrb.gmra.mxu1 %vm340_vm1, %v1112_v36  ;;  %1270 = vmatpush.bf16.msrb.mxu3 %v2297_v57 }
 0x695   :  { %1305 = vmatpush.bf16.msra.mxu0 %v2239_v13  ;;  %1318 = vmatpush.bf16.msrb.mxu1 %v2263_v21 }
 0x698   :  { %1271 = vmatpush.bf16.msrb.mxu3 %v2308_v63 }
 0x699   :  { %1306 = vmatpush.bf16.msra.mxu0 %v2253_v41  ;;  %1319 = vmatpush.bf16.msrb.mxu1 %v2273_v25 }
 0x710   :  { %v1138_v45 = vpop.f32.mrf.mxu0 }
 0x711   :  { %v1151_v12 = vpop.f32.mrf.mxu1  ;;  %v1156_v39 = vadd.f32 %v1138_v45, %v892_v40 }
 0x712   :  { %v1165_v2 = vadd.f32 %v2287_v53, %v1151_v12 }
 0x713   :  { %v1158_v37 = vmul.f32 0.5, %v1156_v39 }
 0x716   :  { %v1125_v49 = vpop.f32.mrf.mxu3 }
 0x717   :  { %v1155_v50 = vadd.f32 %v1125_v49, %v863_v47 }
 0x718   :  { %v1140_v52 = vpop.f32.mrf.mxu0 }
 0x719   :  { %v1157_v54 = vmul.f32 0.5, %v1155_v50  ;;  %v1153_v32 = vpop.f32.mrf.mxu1 }
 0x71b   :  { %1742 = vtanh.f32 %v1157_v54 }
 0x71c   :  { %1744 = vtanh.f32 %v1158_v37 }
 0x71e   :  { %v1127_v59 = vpop.f32.mrf.mxu3 }
 0x71f   :  { %v897_v59 = vadd.f32 %v2346_v56, %v2276_v29 }
 0x721   :  { %v1743_v60 = vpop.eup %1742 }
 0x722   :  { %v1161_v16 = vmul.f32 0.5, %v1743_v60  ;;  %v1745_v1 = vpop.eup %1744 }
 0x723   :  { %v1162_v35 = vmul.f32 0.5, %v1745_v1 }
 0x724   :  { %v1163_v3 = vadd.f32 0.5, %v1161_v16 }
 0x725   :  { %v1164_v6 = vadd.f32 0.5, %v1162_v35 }
 0x726   :  { %v1166_v4 = vmul.f32 %v1165_v2, %v1163_v3 }
 0x727   :  { %v1169_v23 = vsub.f32 1.0, %v1164_v6  ;;  %v1171_v7 = vmul.f32 %v1164_v6, %v1111_v26 }
 0x728   :  { %v1167_v5 = vadd.f32 %v1166_v4, %v921_v33 }
 0x72a   :  { %1746 = vtanh.f32 %v1167_v5  ;;  %v926_v5 = vadd.f32 %v2371_v62, %v2282_v46  ;;  %v871_v62 = vadd.f32 %v2348_v58, %v2230_v0 }
 0x730   :  { %v1747_v61 = vpop.eup %1746 }
 0x731   :  { %v1170_v8 = vmul.f32 %v1747_v61, %v1169_v23 }
 0x733   :  { %v1172_v15 = vadd.f32 %v1171_v7, %v1170_v8 }
 0x735   :  { %v1173_v10 = vpack.c.bf16 %v1172_v15, %v1172_v15 }
 0x737   :  { %1617 = vmatmul.msk.bf16.vlgmr.msrb.gmra.mxu2 %vm340_vm1, %v1173_v10  ;;  %1618 = vmatmul.msk.bf16.vlgmr.msra.gmra.mxu3 %vm340_vm1, %v1173_v10 }
 0x738   :  { %1619 = vmatmul.msk.bf16.vlgmr.msrb.gmra.mxu0 %vm340_vm1, %v1173_v10  ;;  %1331 = vmatpush.bf16.msrb.mxu2 %v2297_v57 }
 0x739   :  { %1366 = vmatpush.bf16.msra.mxu3 %v2239_v13  ;;  %1379 = vmatpush.bf16.msrb.mxu0 %v2263_v21 }
 0x73c   :  { %1332 = vmatpush.bf16.msrb.mxu2 %v2308_v63 }
 0x73d   :  { %1367 = vmatpush.bf16.msra.mxu3 %v2253_v41  ;;  %1380 = vmatpush.bf16.msrb.mxu0 %v2273_v25 }
 0x7b5   :  { %v1212_v14 = vpop.f32.mrf.mxu0 }
 0x7b6   :  { %v1226_v26 = vadd.f32 %v2287_v53, %v1212_v14 }
 0x7ba   :  { %v1186_v18 = vpop.f32.mrf.mxu2  ;;  %v1199_v42 = vpop.f32.mrf.mxu3 }
 0x7bb   :  { %v1216_v11 = vadd.f32 %v1186_v18, %v866_v28  ;;  %v1217_v34 = vadd.f32 %v1199_v42, %v895_v17  ;;  %v900_v18 = vadd.f32 %v2350_v43, %v2276_v29  ;;  %v929_v43 = vadd.f32 %v2373_v30, %v2282_v46  ;;  %v1664_v30 = vld [vmem:[%s2451_s9 + $0x8] sm:$0xff] }
 0x7bd   :  { %v1218_v13 = vmul.f32 0.5, %v1216_v11  ;;  %v1214_v20 = vpop.f32.mrf.mxu0  ;;  %v1219_v21 = vmul.f32 0.5, %v1217_v34 }
 0x7bf   :  { %1748 = vtanh.f32 %v1218_v13 }
 0x7c0   :  { %1750 = vtanh.f32 %v1219_v21 }
 0x7c2   :  { %v1188_v22 = vpop.f32.mrf.mxu2  ;;  %v1201_v41 = vpop.f32.mrf.mxu3 }
 0x7c5   :  { %v1749_v24 = vpop.eup %1748 }
 0x7c6   :  { %v1222_v25 = vmul.f32 0.5, %v1749_v24  ;;  %v1751_v51 = vpop.eup %1750 }
 0x7c7   :  { %v1223_v27 = vmul.f32 0.5, %v1751_v51 }
 0x7c8   :  { %v1224_v55 = vadd.f32 0.5, %v1222_v25 }
 0x7c9   :  { %v1225_v12 = vadd.f32 0.5, %v1223_v27 }
 0x7ca   :  { %v1227_v36 = vmul.f32 %v1226_v26, %v1224_v55 }
 0x7cb   :  { %v1230_v40 = vsub.f32 1.0, %v1225_v12  ;;  %v1232_v49 = vmul.f32 %v1225_v12, %v1172_v15 }
 0x7cc   :  { %v1228_v45 = vadd.f32 %v1227_v36, %v924_v31 }
 0x7ce   :  { %1752 = vtanh.f32 %v1228_v45 }
 0x7d4   :  { %v1753_v47 = vpop.eup %1752 }
 0x7d5   :  { %v1231_v39 = vmul.f32 %v1753_v47, %v1230_v40 }
 0x7d7   :  { %v1233_v50 = vadd.f32 %v1232_v49, %v1231_v39 }
 0x7d9   :  { %v1234_v52 = vpack.c.bf16 %v1233_v50, %v1233_v50 }
 0x7db   :  { %1620 = vmatmul.msk.bf16.vlgmr.msra.gmra.mxu1 %vm340_vm1, %v1234_v52  ;;  %1621 = vmatmul.msk.bf16.vlgmr.msra.gmra.mxu2 %vm340_vm1, %v1234_v52 }
 0x7dc   :  { %1622 = vmatmul.msk.bf16.vlgmr.msrb.gmra.mxu3 %vm340_vm1, %v1234_v52  ;;  %1392 = vmatpush.bf16.msra.mxu1 %v2297_v57 }
 0x7dd   :  { %1447 = vmatpush.bf16.msra.mxu2 %v1664_v30 }
 0x7e0   :  { %1393 = vmatpush.bf16.msra.mxu1 %v2308_v63 }
 0x858   :  { %v1247_v54 = vpop.f32.mrf.mxu1 }
 0x859   :  { %v1277_v32 = vadd.f32 %v1247_v54, %v868_v9 }
 0x85b   :  { %v1279_v37 = vmul.f32 0.5, %v1277_v32  ;;  %v1663_v32 = vld [vmem:[%s2451_s9] sm:$0xff] }
 0x85c   :  { %1448 = vmatpush.bf16.msra.mxu2 %v1663_v32 }
 0x85d   :  { %1754 = vtanh.f32 %v1279_v37  ;;  %v902_v37 = vadd.f32 %v2356_v38, %v2276_v29 }
 0x85e   :  { %v1260_v60 = vpop.f32.mrf.mxu2 }
 0x85f   :  { %v1278_v16 = vadd.f32 %v1260_v60, %v897_v59  ;;  %v1273_v1 = vpop.f32.mrf.mxu3  ;;  %v873_v59 = vadd.f32 %v2352_v48, %v2230_v0  ;;  %v931_v0 = vadd.f32 %v2375_v44, %v2282_v46 }
 0x860   :  { %v1249_v2 = vpop.f32.mrf.mxu1  ;;  %v1287_v63 = vadd.f32 %v2287_v53, %v1273_v1 }
 0x861   :  { %v1280_v3 = vmul.f32 0.5, %v1278_v16 }
 0x863   :  { %v1755_v33 = vpop.eup %1754  ;;  %1756 = vtanh.f32 %v1280_v3 }
 0x864   :  { %v1283_v57 = vmul.f32 0.5, %v1755_v33 }
 0x866   :  { %v1285_v4 = vadd.f32 0.5, %v1283_v57  ;;  %v1262_v35 = vpop.f32.mrf.mxu2 }
 0x867   :  { %v1275_v19 = vpop.f32.mrf.mxu3 }
 0x868   :  { %v1288_v6 = vmul.f32 %v1287_v63, %v1285_v4 }
 0x869   :  { %v1757_v23 = vpop.eup %1756 }
 0x86a   :  { %v1284_v56 = vmul.f32 0.5, %v1757_v23  ;;  %v1289_v61 = vadd.f32 %v1288_v6, %v926_v5 }
 0x86c   :  { %1758 = vtanh.f32 %v1289_v61  ;;  %v1286_v7 = vadd.f32 0.5, %v1284_v56 }
 0x86e   :  { %v1291_v8 = vsub.f32 1.0, %v1286_v7  ;;  %v1293_v10 = vmul.f32 %v1286_v7, %v1233_v50 }
 0x872   :  { %v1759_v15 = vpop.eup %1758 }
 0x873   :  { %v1292_v14 = vmul.f32 %v1759_v15, %v1291_v8 }
 0x875   :  { %v1294_v28 = vadd.f32 %v1293_v10, %v1292_v14 }
 0x877   :  { %v1295_v17 = vpack.c.bf16 %v1294_v28, %v1294_v28 }
 0x879   :  { %1623 = vmatmul.msk.bf16.vlgmr.msra.gmra.mxu0 %vm340_vm1, %v1295_v17  ;;  %1624 = vmatmul.msk.bf16.vlgmr.msrb.gmra.mxu1 %vm340_vm1, %v1295_v17 }
 0x87a   :  { %1625 = vmatmul.msk.bf16.vlgmr.msrb.gmra.mxu2 %vm340_vm1, %v1295_v17 }
 0x8f6   :  { %v1308_v42 = vpop.f32.mrf.mxu0  ;;  %v1321_v11 = vpop.f32.mrf.mxu1 }
 0x8f7   :  { %v1338_v34 = vadd.f32 %v1308_v42, %v871_v62  ;;  %v1339_v13 = vadd.f32 %v1321_v11, %v900_v18 }
 0x8f9   :  { %v1340_v20 = vmul.f32 0.5, %v1338_v34  ;;  %v1341_v21 = vmul.f32 0.5, %v1339_v13 }
 0x8fb   :  { %1760 = vtanh.f32 %v1340_v20 }
 0x8fc   :  { %1762 = vtanh.f32 %v1341_v21 }
 0x8fd   :  { %v1334_v22 = vpop.f32.mrf.mxu2 }
 0x8fe   :  { %v1310_v41 = vpop.f32.mrf.mxu0  ;;  %v1323_v24 = vpop.f32.mrf.mxu1  ;;  %v1348_v58 = vadd.f32 %v2287_v53, %v1334_v22 }
 0x901   :  { %v1761_v25 = vpop.eup %1760 }
 0x902   :  { %v1344_v51 = vmul.f32 0.5, %v1761_v25  ;;  %v1763_v26 = vpop.eup %1762 }
 0x903   :  { %v1345_v27 = vmul.f32 0.5, %v1763_v26 }
 0x904   :  { %v1346_v55 = vadd.f32 0.5, %v1344_v51 }
 0x905   :  { %v1336_v31 = vpop.f32.mrf.mxu2  ;;  %v1347_v12 = vadd.f32 0.5, %v1345_v27 }
 0x906   :  { %v1349_v36 = vmul.f32 %v1348_v58, %v1346_v55 }
 0x907   :  { %v1352_v40 = vsub.f32 1.0, %v1347_v12  ;;  %v1354_v39 = vmul.f32 %v1347_v12, %v1294_v28 }
 0x908   :  { %v1350_v45 = vadd.f32 %v1349_v36, %v929_v43 }
 0x90a   :  { %1764 = vtanh.f32 %v1350_v45 }
 0x910   :  { %v1765_v47 = vpop.eup %1764 }
 0x911   :  { %v1353_v49 = vmul.f32 %v1765_v47, %v1352_v40 }
 0x913   :  { %v1355_v50 = vadd.f32 %v1354_v39, %v1353_v49 }
 0x915   :  { %v1356_v52 = vpack.c.bf16 %v1355_v50, %v1355_v50 }
 0x917   :  { %1626 = vmatmul.msk.bf16.vlgmr.msra.gmra.mxu3 %vm340_vm1, %v1356_v52  ;;  %1627 = vmatmul.msk.bf16.vlgmr.msrb.gmra.mxu0 %vm340_vm1, %v1356_v52 }
 0x918   :  { %1628 = vmatmul.msk.bf16.vlgmr.msra.gmra.mxu1 %vm340_vm1, %v1356_v52 }
 0x994   :  { %v1382_v9 = vpop.f32.mrf.mxu0 }
 0x995   :  { %v1395_v54 = vpop.f32.mrf.mxu1  ;;  %v1400_v60 = vadd.f32 %v1382_v9, %v902_v37 }
 0x996   :  { %v1409_v5 = vadd.f32 %v2287_v53, %v1395_v54  ;;  %v1675_v53 = vld [vmem:[%s2452_s10] ss:$0 sm:$0xff] }
 0x997   :  { %v1402_v57 = vmul.f32 0.5, %v1400_v60 }
 0x99a   :  { %v1369_v16 = vpop.f32.mrf.mxu3 }
 0x99b   :  { %v1399_v1 = vadd.f32 %v1369_v16, %v873_v59 }
 0x99c   :  { %v1384_v2 = vpop.f32.mrf.mxu0 }
 0x99d   :  { %v1401_v3 = vmul.f32 0.5, %v1399_v1  ;;  %v1397_v33 = vpop.f32.mrf.mxu1 }
 0x99f   :  { %1766 = vtanh.f32 %v1401_v3 }
 0x9a0   :  { %1768 = vtanh.f32 %v1402_v57 }
 0x9a2   :  { %v1371_v4 = vpop.f32.mrf.mxu3 }
 0x9a5   :  { %v1767_v63 = vpop.eup %1766 }
 0x9a6   :  { %v1405_v35 = vmul.f32 0.5, %v1767_v63  ;;  %v1769_v19 = vpop.eup %1768 }
 0x9a7   :  { %v1406_v38 = vmul.f32 0.5, %v1769_v19 }
 0x9a8   :  { %v1407_v29 = vadd.f32 0.5, %v1405_v35 }
 0x9a9   :  { %v1408_v23 = vadd.f32 0.5, %v1406_v38 }
 0x9aa   :  { %v1410_v48 = vmul.f32 %v1409_v5, %v1407_v29 }
 0x9ab   :  { %v1413_v56 = vsub.f32 1.0, %v1408_v23  ;;  %v1415_v7 = vmul.f32 %v1408_v23, %v1355_v50 }
 0x9ac   :  { %v1411_v6 = vadd.f32 %v1410_v48, %v931_v0 }
 0x9ae   :  { %1770 = vtanh.f32 %v1411_v6 }
 0x9b4   :  { %v1771_v61 = vpop.eup %1770 }
 0x9b5   :  { %v1414_v8 = vmul.f32 %v1771_v61, %v1413_v56 }
 0x9b7   :  { %v1416_v15 = vadd.f32 %v1415_v7, %v1414_v8 }
 0x9b9   :  { %v1417_v10 = vpack.c.bf16 %v1416_v15, %v1416_v15 }
 0x9bb   :  { %1637 = vmatmul.msk.bf16.vlgmr.msra.gmra.mxu2 %vm340_vm1, %v1417_v10 }
 0xa3e   :  { %v1450_v14 = vpop.f32.mrf.mxu2 }
 0xa3f   :  { %v1451_v28 = vadd.f32 %v1675_v53, %v1450_v14 }
 0xa41   :  { %1454 = vst [vmem:[%s2453_s11] sm:$0xff] %v1451_v28 }
 0xa46   :  { %v1452_v46 = vpop.f32.mrf.mxu2 }
 0xa47   :  { %1459 = vsyncpa [#allocation4], 1 }
 0xa48   :  { %1460 = vsyncpa [#allocation6], 1 }
 0xa49   :  { %1461 = vsyncpa [#allocation9], 1 }
 0xa4a   :  { %1462 = vsyncpa [#allocation12], 1 }

</bundles_post_ra>
